<compile_context>
chip_gen: v7x
topology: tpu7x:2x2x1
jax: 0.10.0
libtpu: 0.0.40
codegen_flags: <defaults>
</compile_context>

<pallas_src>
import math
from functools import partial

import jax
import jax.numpy as jnp
from jax.experimental import pallas as pl
from jax.experimental.pallas import tpu as pltpu

SQRT2 = math.sqrt(2.0)
INV_SQRT2 = 1.0 / SQRT2
NEG_SLOPE = 0.2                      # FusedLeakyReLU negative slope


def _default_vmem_limit():
    """Generation-aware VMEM budget: ~48 MiB on v7x (64 MiB phys), ~96 MiB on v5e/v6e."""
    try:
        cap = pltpu.get_tpu_info().vmem_capacity_bytes
    except Exception:
        cap = 64 * 1024 * 1024
    return int(min(cap - 16 * 1024 * 1024, 96 * 1024 * 1024))


VMEM_LIMIT = _default_vmem_limit()


# ---------------------------------------------------------------------------
# Pallas kernels
# ---------------------------------------------------------------------------
def _matmul_bias_act_kernel(*refs, activate, fuse_skip):
    """out = act(x @ w + b) [optionally then (out + skip)/sqrt(2)].

    Grid = (M tiles, K tiles); K is innermost.  The f32 output block is resident across the
    K axis and used directly as the accumulator (no extra VMEM scratch).  x/w are bf16, the
    MXU accumulates in f32, and the bias / leaky-relu / residual epilogue stays in f32.
    """
    if fuse_skip:
        x_ref, w_ref, b_ref, s_ref, o_ref = refs
    else:
        x_ref, w_ref, b_ref, o_ref = refs
    kk = pl.program_id(1)

    @pl.when(kk == 0)
    def _():
        o_ref[...] = jnp.zeros_like(o_ref)

    o_ref[...] += jnp.dot(x_ref[...], w_ref[...],
                          preferred_element_type=jnp.float32)

    @pl.when(kk == pl.num_programs(1) - 1)
    def _():
        out = o_ref[...] + b_ref[...]
        if activate:  # FusedLeakyReLU: leaky_relu(x + bias, 0.2) * sqrt(2)
            out = jnp.where(out >= 0.0, out, NEG_SLOPE * out) * SQRT2
        if fuse_skip:  # ResBlock residual: (out + skip) / sqrt(2)
            out = (out + s_ref[...]) * jnp.float32(INV_SQRT2)
        o_ref[...] = out.astype(o_ref.dtype)


def _blur_kernel(x_ref, o_ref, *, out_h, out_w):
    """Separable depthwise [1,3,3,1] FIR (StyleGAN2 blur, up=down=1) on a padded NHWC tile.

    Two 4-tap passes (8 MACs/output) instead of 16 unrolled 2-D taps.
    """
    x = x_ref[0].astype(jnp.float32)                    # (Hp, Wp, tc)
    f = (0.125, 0.375, 0.375, 0.125)                    # [1,3,3,1] / 8
    tmp = f[0] * x[:, 0:out_w, :]
    for j in range(1, 4):
        tmp = tmp + f[j] * x[:, j:j + out_w, :]         # horizontal pass -> (Hp, Wo, tc)
    out = f[0] * tmp[0:out_h, :, :]
    for i in range(1, 4):
        out = out + f[i] * tmp[i:i + out_h, :, :]       # vertical pass   -> (Ho, Wo, tc)
    o_ref[0] = out.astype(o_ref.dtype)


def _minibatch_stddev_kernel(x_ref, o_ref, *, group):
    """StyleGAN2 minibatch-stddev statistic (stddev_feat == 1), NHWC."""
    x = x_ref[...].astype(jnp.float32)                  # (B, H, W, C)
    b, h, w, _ = x.shape
    n = b // group
    xs = [x[g * n:(g + 1) * n] for g in range(group)]   # each (n, H, W, C)
    mean = sum(xs) / group
    var = sum((xi - mean) ** 2 for xi in xs) / group    # biased variance over group
    std = jnp.sqrt(var + 1e-8)
    stat = jnp.mean(std, axis=(1, 2, 3), keepdims=True)  # (n, 1, 1, 1)
    stat_b = jnp.concatenate([stat] * group, axis=0)     # (B, 1, 1, 1) == repeat(group, ...)
    o_ref[...] = jnp.broadcast_to(stat_b, (b, h, w, 1)).astype(o_ref.dtype)


# ---------------------------------------------------------------------------
# Pallas wrappers
# ---------------------------------------------------------------------------
def _largest_tile(dim, align, cap):
    """Largest divisor of `dim` that is a multiple of `align` and <= cap; else full dim."""
    if dim <= cap:
        return dim
    start = cap - (cap % align)
    for cand in range(start, 0, -align):
        if dim % cand == 0:
            return cand
    return dim


def matmul_bias_act(x, w, b, *, activate, skip=None):
    """act(x @ w + b) with optional fused residual epilogue. x/w fed to the MXU as bf16."""
    m, k = x.shape
    n = w.shape[1]
    tm = _largest_tile(m, 8, 1024)
    tk = _largest_tile(k, 128, 2048)
    nm, nk = m // tm, k // tk

    xb = x.astype(jnp.bfloat16)
    wb = w.astype(jnp.bfloat16)
    bias = b.reshape(1, n).astype(jnp.float32)

    in_specs = [
        pl.BlockSpec((tm, tk), lambda i, kk: (i, kk)),
        pl.BlockSpec((tk, n), lambda i, kk: (kk, 0)),
        pl.BlockSpec((1, n), lambda i, kk: (0, 0)),
    ]
    args = [xb, wb, bias]
    if skip is not None:
        in_specs.append(pl.BlockSpec((tm, n), lambda i, kk: (i, 0)))
        args.append(skip.astype(jnp.float32))

    return pl.pallas_call(
        partial(_matmul_bias_act_kernel, activate=activate,
                fuse_skip=skip is not None),
        out_shape=jax.ShapeDtypeStruct((m, n), jnp.float32),
        grid=(nm, nk),
        in_specs=in_specs,
        out_specs=pl.BlockSpec((tm, n), lambda i, kk: (i, 0)),
        compiler_params=pltpu.CompilerParams(
            dimension_semantics=("parallel", "arbitrary"),
            vmem_limit_bytes=VMEM_LIMIT),
    )(*args)


def blur(x, pad0, pad1):
    """upfirdn2d(x, outer([1,3,3,1])/64, pad=(pad0, pad1)); NHWC, tiled (batch, C-chunks)."""
    # TODO(synk): fold the padding into the kernel (masked edge taps) instead of jnp.pad.
    bsz, _, _, c = x.shape
    xp = jnp.pad(x, ((0, 0), (pad0, pad1), (pad0, pad1), (0, 0)))
    hp, wp = xp.shape[1], xp.shape[2]
    ho, wo = hp - 3, wp - 3
    tc = 128 if c % 128 == 0 else c
    nc = c // tc
    return pl.pallas_call(
        partial(_blur_kernel, out_h=ho, out_w=wo),
        out_shape=jax.ShapeDtypeStruct((bsz, ho, wo, c), jnp.float32),
        grid=(bsz, nc),
        in_specs=[pl.BlockSpec((1, hp, wp, tc), lambda b, cc: (b, 0, 0, cc))],
        out_specs=pl.BlockSpec((1, ho, wo, tc), lambda b, cc: (b, 0, 0, cc)),
        compiler_params=pltpu.CompilerParams(
            dimension_semantics=("parallel", "parallel"),
            vmem_limit_bytes=VMEM_LIMIT),
    )(xp.astype(jnp.float32))


def minibatch_stddev(x, stddev_group=4):
    bsz, h, w, _ = x.shape
    group = min(bsz, stddev_group)
    sd = pl.pallas_call(
        partial(_minibatch_stddev_kernel, group=group),
        out_shape=jax.ShapeDtypeStruct((bsz, h, w, 1), jnp.float32),
        compiler_params=pltpu.CompilerParams(vmem_limit_bytes=VMEM_LIMIT),
    )(x.astype(jnp.float32))
    return jnp.concatenate([x, sd], axis=-1)


# ---------------------------------------------------------------------------
# Model glue (param setup, im2col patch extraction, layer plumbing)
# ---------------------------------------------------------------------------
def conv_layer_apply(x, p, skip=None):
    """StyleGAN2 ConvLayer: [Blur if downsample] -> EqualConv2d -> [FusedLeakyReLU].

    If `skip` is given, the residual (out + skip)/sqrt(2) is fused into the matmul epilogue.
    """
    # TODO(synk): longer term, move im2col + pad into the matmul kernel (halo BlockSpec)
    # instead of materializing k*k*Cin patch tensors in HBM.
    k = p["kernel"]
    if p["downsample"]:
        x = blur(x, p["pad0"], p["pad1"])
        pad, stride = 0, 2
    else:
        pad, stride = k // 2, 1
    if pad:
        x = jnp.pad(x, ((0, 0), (pad, pad), (pad, pad), (0, 0)))

    x = x.astype(jnp.bfloat16)                         # bf16 patches: halve im2col HBM traffic
    bsz, hp, wp, cin = x.shape
    ho, wo = hp - k + 1, wp - k + 1
    if stride == 2:                                    # strided im2col: never materialize full res
        if k == 1:
            patches = x[:, :ho:2, :wo:2, :]
        else:
            patches = jnp.concatenate(
                [x[:, i:i + ho:2, j:j + wo:2, :] for i in range(k) for j in range(k)],
                axis=-1)                               # (B, oh, ow, k*k*cin), (i,j,c) order
    else:
        if k == 1:
            patches = x
        else:
            patches = jnp.concatenate(
                [x[:, i:i + ho, j:j + wo, :] for i in range(k) for j in range(k)],
                axis=-1)

    bsz, oh, ow, kk = patches.shape
    cout = p["w"].shape[-1]
    skip_flat = None if skip is None else skip.reshape(bsz * oh * ow, cout)
    out = matmul_bias_act(patches.reshape(bsz * oh * ow, kk),
                          p["w"].reshape(kk, cout), p["b"],
                          activate=p["activate"], skip=skip_flat)
    return out.reshape(bsz, oh, ow, cout)


def res_block_apply(x, p):
    skip = conv_layer_apply(x, p["skip"])                     # 1x1 downsample, no activation
    out = conv_layer_apply(x, p["conv1"])
    out = conv_layer_apply(out, p["conv2"], skip=skip)        # fused (act(conv2)+skip)/sqrt(2)
    return out


def forward(params, x_nchw):
    x = jnp.transpose(x_nchw, (0, 2, 3, 1)).astype(jnp.float32)   # NCHW -> NHWC
    x = x * 2.0 - 1.0
    x = conv_layer_apply(x, params["from_rgb"])
    for blk in params["blocks"]:
        x = res_block_apply(x, blk)
    x = minibatch_stddev(x)
    x = conv_layer_apply(x, params["last_conv"])
    bsz = x.shape[0]
    # lin1_w rows were permuted at build time to accept the NHWC flatten order directly.
    x = x.reshape(bsz, -1)
    x = matmul_bias_act(x, params["lin1_w"], params["lin1_b"], activate=True)
    x = matmul_bias_act(x, params["lin2_w"], params["lin2_b"], activate=False)
    return x


def build_params(key, size=32, channel_multiplier=2, small32=True):
    if small32:
        channels = {4: 512, 8: 512, 16: 256, 32: 128}
    else:
        channels = {4: 512, 8: 512, 16: 512, 32: 512,
                    64: int(256 * channel_multiplier),
                    128: int(128 * channel_multiplier),
                    256: int(64 * channel_multiplier),
                    512: int(32 * channel_multiplier),
                    1024: int(16 * channel_multiplier)}
    keys = iter(jax.random.split(key, 64))

    def conv_layer_params(cin, cout, k, downsample=False, activate=True):
        scale = 1.0 / math.sqrt(cin * k * k)            # EqualConv2d equalized-lr scale
        w = jax.random.normal(next(keys), (k, k, cin, cout), jnp.float32) * scale
        b = jnp.zeros((cout,), jnp.float32)             # conv / FusedLeakyReLU bias (zero init)
        p = {"w": w, "b": b, "kernel": k,
             "downsample": downsample, "activate": activate}
        if downsample:
            pp = (4 - 2) + (k - 1)                      # ConvLayer blur padding
            p["pad0"], p["pad1"] = (pp + 1) // 2, pp // 2
        return p

    params = {"from_rgb": conv_layer_params(3, channels[size], 1)}
    log_size = int(math.log2(size))
    in_ch = channels[size]
    blocks = []
    for i in range(log_size, 2, -1):
        out_ch = channels[2 ** (i - 1)]
        blocks.append({
            "conv1": conv_layer_params(in_ch, in_ch, 3),
            "conv2": conv_layer_params(in_ch, out_ch, 3, downsample=True),
            "skip": conv_layer_params(in_ch, out_ch, 1, downsample=True,
                                      activate=False),
        })
        in_ch = out_ch
    params["blocks"] = blocks
    params["last_conv"] = conv_layer_params(in_ch + 1, channels[4], 3)

    c4 = channels[4]
    d_in = c4 * 4 * 4                                   # EqualLinear (scale = 1/sqrt(in_dim))
    w1 = (jax.random.normal(next(keys), (d_in, c4), jnp.float32) / math.sqrt(d_in))
    # Permute rows from torch's NCHW flatten order (c,h,w) to our NHWC flatten order (h,w,c),
    # so forward() can skip the final layout transpose.
    w1 = w1.reshape(c4, 4, 4, c4).transpose(1, 2, 0, 3).reshape(d_in, c4)
    params["lin1_w"] = w1
    params["lin1_b"] = jnp.zeros((c4,), jnp.float32)
    params["lin2_w"] = (jax.random.normal(next(keys), (c4, 1), jnp.float32)
                        / math.sqrt(c4))
    params["lin2_b"] = jnp.zeros((1,), jnp.float32)
    return params


if __name__ == "__main__":
    root = jax.random.PRNGKey(0)
    pkey, xkey = jax.random.split(root)
    size = 32                                  # small config: ResidualDiscriminator(32, small32=True)
    params = build_params(pkey, size=size, small32=True)
    # Discriminator input: images in [0, 1], NCHW like PyTorch.
    x = jax.random.uniform(xkey, (2, 3, size, size), jnp.float32)
    out = forward(params, x)
    out = jax.block_until_ready(out)
    assert out.shape == (2, 1) and out.dtype == jnp.float32
    print("KERNEL_OK")
</pallas_src>

<mosaic_0001>
module attributes {stable_mosaic.version = 11 : i64} {
  func.func @_matmul_bias_act_kernel(%arg0: i32, %arg1: i32, %arg2: memref<1024x3xbf16, #tpu.memory_space<vmem>>, %arg3: memref<3x128xbf16, #tpu.memory_space<vmem>>, %arg4: memref<1x128xf32, #tpu.memory_space<vmem>>, %arg5: memref<1024x128xf32, #tpu.memory_space<vmem>>) attributes {dimension_semantics = [#tpu.dimension_semantics<parallel>, #tpu.dimension_semantics<arbitrary>], iteration_bounds = array<i64: 2, 1>, scalar_prefetch = 0 : i64, scratch_operands = 0 : i64, tpu.core_type = #tpu.core_type<tc>, window_params = [{transform_indices = @transform_0, window_bounds = array<i64: 1024, 3>}, {transform_indices = @transform_1, window_bounds = array<i64: 3, 128>}, {pipeline_mode = #tpu.pipeline_mode<synchronous>, transform_indices = @transform_2, window_bounds = array<i64: 1, 128>}, {transform_indices = @transform_3, window_bounds = array<i64: 1024, 128>}]} {
    %c0_i32 = arith.constant 0 : i32
    %0 = arith.cmpi eq, %arg1, %c0_i32 : i32
    %1 = arith.extui %0 : i1 to i32
    %c0_i32_0 = arith.constant 0 : i32
    %2 = arith.cmpi ne, %1, %c0_i32_0 : i32
    scf.if %2 {
      %cst_10 = arith.constant 0.000000e+00 : f32
      %12 = vector.broadcast %cst_10 : f32 to vector<1024x128xf32>
      %c0_11 = arith.constant 0 : index
      %c0_12 = arith.constant 0 : index
      %13 = vector.load %arg5[%c0_11, %c0_12] : memref<1024x128xf32, #tpu.memory_space<vmem>>, vector<1024x128xf32>
      tpu.vector_store %arg5[%c0_11, %c0_12], %12 {strides = array<i32>} : memref<1024x128xf32, #tpu.memory_space<vmem>>, vector<1024x128xf32>,
    } else {
    }
    %c0 = arith.constant 0 : index
    %c0_1 = arith.constant 0 : index
    %3 = vector.load %arg5[%c0, %c0_1] : memref<1024x128xf32, #tpu.memory_space<vmem>>, vector<1024x128xf32>
    %c0_2 = arith.constant 0 : index
    %c0_3 = arith.constant 0 : index
    %4 = vector.load %arg2[%c0_2, %c0_3] : memref<1024x3xbf16, #tpu.memory_space<vmem>>, vector<1024x3xbf16>
    %c0_4 = arith.constant 0 : index
    %c0_5 = arith.constant 0 : index
    %5 = vector.load %arg3[%c0_4, %c0_5] : memref<3x128xbf16, #tpu.memory_space<vmem>>, vector<3x128xbf16>
    %cst = arith.constant dense<0.000000e+00> : vector<1024x128xf32>
    %6 = tpu.matmul %4, %5, %cst {dimension_numbers = #tpu.dot_dimension_numbers<[1], [0], [0], [1], [0, 0, 1, 1], [], []>} : vector<1024x3xbf16>, vector<3x128xbf16>, vector<1024x128xf32> -> vector<1024x128xf32>
    %7 = arith.addf %3, %6 : vector<1024x128xf32>
    %c0_6 = arith.constant 0 : index
    %c0_7 = arith.constant 0 : index
    %8 = vector.load %arg5[%c0_6, %c0_7] : memref<1024x128xf32, #tpu.memory_space<vmem>>, vector<1024x128xf32>
    tpu.vector_store %arg5[%c0_6, %c0_7], %7 {strides = array<i32>} : memref<1024x128xf32, #tpu.memory_space<vmem>>, vector<1024x128xf32>,
    %c0_i32_8 = arith.constant 0 : i32
    %9 = arith.cmpi eq, %arg1, %c0_i32_8 : i32
    %10 = arith.extui %9 : i1 to i32
    %c0_i32_9 = arith.constant 0 : i32
    %11 = arith.cmpi ne, %10, %c0_i32_9 : i32
    scf.if %11 {
      %c0_10 = arith.constant 0 : index
      %c0_11 = arith.constant 0 : index
      %12 = vector.load %arg5[%c0_10, %c0_11] : memref<1024x128xf32, #tpu.memory_space<vmem>>, vector<1024x128xf32>
      %c0_12 = arith.constant 0 : index
      %c0_13 = arith.constant 0 : index
      %13 = vector.load %arg4[%c0_12, %c0_13] : memref<1x128xf32, #tpu.memory_space<vmem>>, vector<1x128xf32>
      %14 = vector.broadcast %13 : vector<1x128xf32> to vector<1024x128xf32>
      %15 = arith.addf %12, %14 : vector<1024x128xf32>
      %cst_14 = arith.constant 0.000000e+00 : f32
      %16 = vector.broadcast %cst_14 : f32 to vector<1024x128xf32>
      %17 = arith.cmpf oge, %15, %16 : vector<1024x128xf32>
      %cst_15 = arith.constant 2.000000e-01 : f32
      %18 = vector.broadcast %cst_15 : f32 to vector<1024x128xf32>
      %19 = arith.mulf %18, %15 : vector<1024x128xf32>
      %20 = arith.select %17, %15, %19 : vector<1024x128xi1>, vector<1024x128xf32>
      %cst_16 = arith.constant 1.41421354 : f32
      %21 = vector.broadcast %cst_16 : f32 to vector<1024x128xf32>
      %22 = arith.mulf %20, %21 : vector<1024x128xf32>
      %c0_17 = arith.constant 0 : index
      %c0_18 = arith.constant 0 : index
      %23 = vector.load %arg5[%c0_17, %c0_18] : memref<1024x128xf32, #tpu.memory_space<vmem>>, vector<1024x128xf32>
      tpu.vector_store %arg5[%c0_17, %c0_18], %22 {strides = array<i32>} : memref<1024x128xf32, #tpu.memory_space<vmem>>, vector<1024x128xf32>,
    } else {
    }
    return
  }
  func.func @transform_0(%arg0: i32, %arg1: i32) -> (i32, i32) {
    %c0_i32 = arith.constant 0 : i32
    return %arg0, %arg1 : i32, i32
  }
  func.func @transform_1(%arg0: i32, %arg1: i32) -> (i32, i32) {
    %c0_i32 = arith.constant 0 : i32
    %c0_i32_0 = arith.constant 0 : i32
    return %arg1, %c0_i32 : i32, i32
  }
  func.func @transform_2(%arg0: i32, %arg1: i32) -> (i32, i32) {
    %c0_i32 = arith.constant 0 : i32
    %c0_i32_0 = arith.constant 0 : i32
    %c0_i32_1 = arith.constant 0 : i32
    return %c0_i32, %c0_i32_0 : i32, i32
  }
  func.func @transform_3(%arg0: i32, %arg1: i32) -> (i32, i32) {
    %c0_i32 = arith.constant 0 : i32
    %c0_i32_0 = arith.constant 0 : i32
    return %arg0, %c0_i32 : i32, i32
  }
}

</mosaic_0001>

<bundles_post_ra>
// kernel: tpu_custom_call.1
= control target key start
LH: loop header
LB: loop body
LE: loop exit
PB: predicated region body
PF: predicated region fallthrough
CT: control target
= control target key end

     0   :  { %8 = vsyncpa [#allocation3], 0  ;;  %s4335_s0 = inlined_call_operand.vmem [shape: bf16[2048,3], index: 0, kind: input, shape index: {}]   ;;  %s4336_s1 = inlined_call_operand.vmem [shape: bf16[3,128], index: 1, kind: input, shape index: {}]   ;;  %s4337_s2 = inlined_call_operand.vmem [shape: f32[1,128], index: 2, kind: input, shape index: {}]   ;;  %s4338_s3 = inlined_call_operand.hbm [shape: f32[2048,128], index: 3, kind: output, shape index: {}]  }
   0x1   :  { %10 = vsyncpa [#allocation3 + $0x1], 0  ;;  %s3500_s12 = smov 0   ;;  %s3502_s13 = smov 0  }
   0x2   :  { %s3504_s14 = smov 0   ;;  %s3506_s15 = smov 0  }
   0x3   :  { %s3508_s16 = smov 0   ;;  %s3510_s17 = smov 0  }
   0x4 LB: > { %s2931_s18 = sadd.s32 4294967295, %s3474_s17   ;;  %s2932_s19 = sadd.s32 4294967294, %s3474_s17   ;;  %s3474_s17 = sphi %s3510_s17, %s16_s17   ;;  %s3470_s16 = sphi %s3508_s16, %s4345_s16   ;;  %s3466_s15 = sphi %s3506_s15, %s4344_s15   ;;  %s3462_s14 = sphi %s3504_s14, %s4343_s14   ;;  %s3458_s13 = sphi %s3502_s13, %s4342_s13   ;;  %s3454_s12 = sphi %s3500_s12, %s4341_s12  }
   0x5   : > { %s28_s20 = sadd.s32 1, %s3470_s16  ;;  %s110_s21 = sadd.s32 1, %s3462_s14 }
   0x6   : > { %p30_p0 = scmp.ge.s32.totalorder %s28_s20, 2  ;;  %p120_p1 = scmp.ne.s32.totalorder %s3462_s14, %s3458_s13 }
   0x7   : > { %p121_p2 = scmp.eq.s32.totalorder %s2931_s18, 1  ;;  %p126_p3 = scmp.ne.s32.totalorder %s3458_s13, %s3454_s12 }
   0x8   : > { %s4347_s20 = smov (%p30_p0, %s28_s20), 0  ;;  %p127_p5 = scmp.eq.s32.totalorder %s2932_s19, 1 }
   0x9   : > { %p3540_p4 = por %p121_p2, %p120_p1  ;;  %s107_s23 = ssub.s32 %s3470_s16, %s4347_s20 }
   0xa   : > { %p2936_p6 = scmp.ge.s32.totalorder %s3474_s17, 1  ;;  %p108_p7 = scmp.eq.s32.totalorder %s107_s23, 0 }
   0xb   : > { %p3547_p8 = por %p127_p5, %p126_p3  ;;  %p167_p9 = scmp.lt.s32.totalorder %s3474_s17, 3 }
   0xc   : > { %s3553_s25 = scalar_select %p108_p7, %s3462_s14, %s110_s21  }
   0xd   : > { %p168_p10 = pnand %p2936_p6, %p167_p9 }
   0xe   : > { %v601_v0 = vld [vmem:[%s4336_s1] sm:$0x3] (!%p168_p10)  ;;  %vm1115_vm0 = vcmask (!%p168_p10), 1040384   ;;  %vm1116_vm1 = vcmask (!%p168_p10), 1041408   ;;  %s2938_s28 = sshll.u32 (!%p168_p10), %s3466_s15, 7  ;;  %v3476_v1 = vmov (!%p168_p10), 65535  }
   0xf   : > { %171 = sbr.rel (%p168_p10) target bundleno = 424 (0x1a8), region = 32  ;;  %v1117_v2 = vsel (!%p168_p10), %vm1115_vm0, 4294967295, %v3476_v1  ;;  %p199_p11 = scmp.lt.s32.totalorder (!%p168_p10), %s2938_s28, 255  ;;  %vm922_vm2 = vcmask (!%p168_p10), 23552  }
  0x10   : > { %v1118_v3 = vsel (!%p168_p10), %vm1116_vm1, %v1117_v2, 0  ;;  %s195_s8 = sand.u32 (!%p168_p10), 1, %s3458_s13   ;;  %s3074_s19 = sshll.u32 (!%p168_p10), %s3466_s15, 14 }
  0x11   : > { %v1120_v4 = vand.u32 (!%p168_p10), %v1118_v3, %v601_v0  ;;  %s2937_s9 = sshll.u32 (!%p168_p10), %s195_s8, 10  ;;  %s4281_s27 = scalar_lea.hbm (!%p168_p10), %s4338_s3, %s3074_s19 }
  0x12   : > { %s3706_s10 = scalar_lea.vmem (!%p168_p10), [#allocation2], %s2937_s9  ;;  %s4289_s15 = scalar_lea.sflag (!%p168_p10), [#allocation3], %s195_s8 }
  0x13   : > { %3140 = vmatprep.subr.bf16.mxu0 (!%p168_p10), %v1120_v4  ;;  %3270 = vmatprep.subr.bf16.mxu1 (!%p168_p10), %v1120_v4  ;;  %s2843_s21 = sshll.u32 (!%p168_p10), %s3706_s10, 4  ;;  %s4283_s21 = int_to_ptr.vmem [resolvable:$true] %s2843_s21 }
  0x14   : > { %3141 = vmatpush3.bf16.msra.mxu0 (!%p168_p10), %v1120_v4  ;;  %3271 = vmatpush3.bf16.msra.mxu1 (!%p168_p10), %v1120_v4 }
  0x16   : > { %s4349_s28 = smov (!%p199_p11, %s2938_s28), 255 }
  0x17   : > { %s2939_s29 = sshll.u32 %s4349_s28, 2  ;;  %s3396_s28 = scalar_lea.vmem %s4283_s21, 16384 }
  0x18   : > { %s3562_s5 = scalar_lea.vmem %s4335_s0, %s2939_s29  ;;  %p3397_p12 = scmp.ne.s32.totalorder %s4283_s21, %s3396_s28 }
  0x19   : > { %v3331_v5 = vld [vmem:[%s3562_s5] sm:$0xff]   ;;  %v3333_v7 = vld [vmem:[%s3562_s5 + $0x8] sm:$0xff]   ;;  %v3335_v9 = vld [vmem:[%s3562_s5 + $0x10] sm:$0xff]   ;;  %s3477_s29 = smov [#allocation2]  }
  0x1a   : > { %v3332_v6 = vld [vmem:[%s3562_s5 + $0x100] sm:$0xff]   ;;  %3142 = vmatprep.mubr.msk.bf16.mxu0 %vm922_vm2, %v3331_v5  ;;  %v3334_v8 = vld [vmem:[%s3562_s5 + $0x108] sm:$0xff]   ;;  %v3336_v10 = vld [vmem:[%s3562_s5 + $0x110] sm:$0xff]   ;;  %p3398_p13 = pnand %p3397_p12, %p3540_p4  ;;  %s3400_s30 = sshll.u32 %s3477_s29, 4  ;;  %s3401_s30 = int_to_ptr.vmem [resolvable:$false] %s3400_s30 }
  0x1b   : > { %3206 = vmatprep.mubr.msk.bf16.mxu1 %vm922_vm2, %v3332_v6  ;;  %3143 = vmatmul.mubr.msk.bf16.vlgmr.msra.gmra.mrb[0].mxu0 %vm922_vm2, %v3333_v7  ;;  %v3337_v11 = vld [vmem:[%s3562_s5 + $0x18] sm:$0xff]   ;;  %v3339_v13 = vld [vmem:[%s3562_s5 + $0x20] sm:$0xff]   ;;  %v3341_v15 = vld [vmem:[%s3562_s5 + $0x28] sm:$0xff]   ;;  %s3402_s4 = scalar_lea.vmem %s3401_s30, 32768  ;;  %p3403_p1 = scmp.lt.s32.totalorder %s4283_s21, %s3401_s30 }
  0x1c   : > { %3207 = vmatmul.mubr.msk.bf16.vlgmr.msra.gmra.mrb[0].mxu1 %vm922_vm2, %v3334_v8  ;;  %3146 = vmatprep.mubr.msk.bf16.mxu0 %vm922_vm2, %v3335_v9  ;;  %v3338_v12 = vld [vmem:[%s3562_s5 + $0x118] sm:$0xff]   ;;  %v3340_v14 = vld [vmem:[%s3562_s5 + $0x120] sm:$0xff]   ;;  %v3342_v16 = vld [vmem:[%s3562_s5 + $0x128] sm:$0xff]   ;;  %p3399_p0 = pneg %p3398_p13  ;;  %p3404_p2 = scmp.lt.s32.totalorder %s3402_s4, %s3396_s28 }
  0x1d   : > { %3210 = vmatprep.mubr.msk.bf16.mxu1 %vm922_vm2, %v3336_v10  ;;  %v3343_v17 = vld [vmem:[%s3562_s5 + $0x30] sm:$0xff]   ;;  %v3345_v19 = vld [vmem:[%s3562_s5 + $0x38] sm:$0xff]   ;;  %v3347_v21 = vld [vmem:[%s3562_s5 + $0x40] sm:$0xff]  }
  0x1e   : > { %v3344_v18 = vld [vmem:[%s3562_s5 + $0x130] sm:$0xff]   ;;  %v3346_v20 = vld [vmem:[%s3562_s5 + $0x138] sm:$0xff]   ;;  %v3348_v22 = vld [vmem:[%s3562_s5 + $0x140] sm:$0xff]   ;;  %p3405_p3 = por %p3404_p2, %p3403_p1 }
  0x1f   : > { %v3349_v23 = vld [vmem:[%s3562_s5 + $0x48] sm:$0xff]   ;;  %v3351_v25 = vld [vmem:[%s3562_s5 + $0x50] sm:$0xff]   ;;  %v3353_v27 = vld [vmem:[%s3562_s5 + $0x58] sm:$0xff]  }
  0x20   : > { %v3350_v24 = vld [vmem:[%s3562_s5 + $0x148] sm:$0xff]   ;;  %v3352_v26 = vld [vmem:[%s3562_s5 + $0x150] sm:$0xff]   ;;  %v3354_v28 = vld [vmem:[%s3562_s5 + $0x158] sm:$0xff]   ;;  %p3406_p5 = pnand %p3405_p3, %p3399_p0 }
  0x21   : > { %v3355_v29 = vld [vmem:[%s3562_s5 + $0x60] sm:$0xff]   ;;  %v3357_v31 = vld [vmem:[%s3562_s5 + $0x68] sm:$0xff]   ;;  %v3359_v33 = vld [vmem:[%s3562_s5 + $0x70] sm:$0xff]  }
  0x22   : > { %v3356_v30 = vld [vmem:[%s3562_s5 + $0x160] sm:$0xff]   ;;  %v3358_v32 = vld [vmem:[%s3562_s5 + $0x168] sm:$0xff]   ;;  %v3360_v34 = vld [vmem:[%s3562_s5 + $0x170] sm:$0xff]  }
  0x23   : > { %3147 = vmatmul.mubr.msk.bf16.gmra.mrb[4].mxu0 %vm922_vm2, %v3337_v11  ;;  %v3361_v35 = vld [vmem:[%s3562_s5 + $0x78] sm:$0xff]   ;;  %v3363_v37 = vld [vmem:[%s3562_s5 + $0x80] sm:$0xff]   ;;  %v3365_v39 = vld [vmem:[%s3562_s5 + $0x88] sm:$0xff]  }
  0x24   : > { %3211 = vmatmul.mubr.msk.bf16.gmra.mrb[4].mxu1 %vm922_vm2, %v3338_v12  ;;  %3150 = vmatprep.mubr.msk.bf16.mxu0 %vm922_vm2, %v3339_v13  ;;  %v3362_v36 = vld [vmem:[%s3562_s5 + $0x178] sm:$0xff]   ;;  %v3364_v38 = vld [vmem:[%s3562_s5 + $0x180] sm:$0xff]   ;;  %v3366_v40 = vld [vmem:[%s3562_s5 + $0x188] sm:$0xff]  }
  0x25   : > { %3214 = vmatprep.mubr.msk.bf16.mxu1 %vm922_vm2, %v3340_v14  ;;  %v3367_v41 = vld [vmem:[%s3562_s5 + $0x90] sm:$0xff]   ;;  %v3369_v43 = vld [vmem:[%s3562_s5 + $0x98] sm:$0xff]   ;;  %v3371_v45 = vld [vmem:[%s3562_s5 + $0xa0] sm:$0xff]  }
  0x26   : > { %v3368_v42 = vld [vmem:[%s3562_s5 + $0x190] sm:$0xff]   ;;  %v3370_v44 = vld [vmem:[%s3562_s5 + $0x198] sm:$0xff]   ;;  %v3372_v46 = vld [vmem:[%s3562_s5 + $0x1a0] sm:$0xff]  }
  0x27   : > { %v3373_v47 = vld [vmem:[%s3562_s5 + $0xa8] sm:$0xff]   ;;  %v3375_v49 = vld [vmem:[%s3562_s5 + $0xb0] sm:$0xff]   ;;  %v3377_v51 = vld [vmem:[%s3562_s5 + $0xb8] sm:$0xff]  }
  0x28   : > { %v3374_v48 = vld [vmem:[%s3562_s5 + $0x1a8] sm:$0xff]   ;;  %v3376_v50 = vld [vmem:[%s3562_s5 + $0x1b0] sm:$0xff]   ;;  %v3378_v52 = vld [vmem:[%s3562_s5 + $0x1b8] sm:$0xff]  }
  0x29   : > { %v3379_v53 = vld [vmem:[%s3562_s5 + $0xc0] sm:$0xff]   ;;  %v3381_v55 = vld [vmem:[%s3562_s5 + $0xc8] sm:$0xff]   ;;  %v3383_v57 = vld [vmem:[%s3562_s5 + $0xd0] sm:$0xff]  }
  0x2a   : > { %v3380_v54 = vld [vmem:[%s3562_s5 + $0x1c0] sm:$0xff]   ;;  %v3382_v56 = vld [vmem:[%s3562_s5 + $0x1c8] sm:$0xff]   ;;  %v3384_v58 = vld [vmem:[%s3562_s5 + $0x1d0] sm:$0xff]  }
  0x2b   : > { %3151 = vmatmul.mubr.msk.bf16.gmra.mrb[8].mxu0 %vm922_vm2, %v3341_v15  ;;  %v3385_v59 = vld [vmem:[%s3562_s5 + $0xd8] sm:$0xff]   ;;  %v3387_v61 = vld [vmem:[%s3562_s5 + $0xe0] sm:$0xff]   ;;  %v3389_v63 = vld [vmem:[%s3562_s5 + $0xe8] sm:$0xff]  }
  0x2c   : > { %3215 = vmatmul.mubr.msk.bf16.gmra.mrb[8].mxu1 %vm922_vm2, %v3342_v16  ;;  %3154 = vmatprep.mubr.msk.bf16.mxu0 %vm922_vm2, %v3343_v17  ;;  %v3386_v60 = vld [vmem:[%s3562_s5 + $0x1d8] sm:$0xff]   ;;  %v3388_v62 = vld [vmem:[%s3562_s5 + $0x1e0] sm:$0xff]   ;;  %v3390_v0 = vld [vmem:[%s3562_s5 + $0x1e8] sm:$0xff]  }
  0x2d   : > { %3218 = vmatprep.mubr.msk.bf16.mxu1 %vm922_vm2, %v3344_v18  ;;  %v3391_v1 = vld [vmem:[%s3562_s5 + $0xf0] sm:$0xff]   ;;  %v3393_v3 = vld [vmem:[%s3562_s5 + $0xf8] sm:$0xff]   ;;  %v3695_v6 = vld [vmem:[%s4337_s2] ss:$0 sm:$0xff] }
  0x2e   : > { %v3392_v2 = vld [vmem:[%s3562_s5 + $0x1f0] sm:$0xff]   ;;  %v3394_v4 = vld [vmem:[%s3562_s5 + $0x1f8] sm:$0xff]  }
  0x33   : > { %3155 = vmatmul.mubr.msk.bf16.gmra.mrb[12].mxu0 %vm922_vm2, %v3345_v19 }
  0x34   : > { %3219 = vmatmul.mubr.msk.bf16.gmra.mrb[12].mxu1 %vm922_vm2, %v3346_v20  ;;  %3158 = vmatprep.mubr.msk.bf16.mxu0 %vm922_vm2, %v3347_v21 }
  0x35   : > { %3222 = vmatprep.mubr.msk.bf16.mxu1 %vm922_vm2, %v3348_v22 }
  0x3b   : > { %3159 = vmatmul.mubr.msk.bf16.gmra.mrb[16].mxu0 %vm922_vm2, %v3349_v23 }
  0x3c   : > { %3223 = vmatmul.mubr.msk.bf16.gmra.mrb[16].mxu1 %vm922_vm2, %v3350_v24  ;;  %3162 = vmatprep.mubr.msk.bf16.mxu0 %vm922_vm2, %v3351_v25 }
  0x3d   : > { %3226 = vmatprep.mubr.msk.bf16.mxu1 %vm922_vm2, %v3352_v26 }
  0x43   : > { %3163 = vmatmul.mubr.msk.bf16.gmra.mrb[20].mxu0 %vm922_vm2, %v3353_v27 }
  0x44   : > { %3227 = vmatmul.mubr.msk.bf16.gmra.mrb[20].mxu1 %vm922_vm2, %v3354_v28  ;;  %3166 = vmatprep.mubr.msk.bf16.mxu0 %vm922_vm2, %v3355_v29 }
  0x45   : > { %3230 = vmatprep.mubr.msk.bf16.mxu1 %vm922_vm2, %v3356_v30 }
  0x4b   : > { %3167 = vmatmul.mubr.msk.bf16.gmra.mrb[24].mxu0 %vm922_vm2, %v3357_v31 }
  0x4c   : > { %3231 = vmatmul.mubr.msk.bf16.gmra.mrb[24].mxu1 %vm922_vm2, %v3358_v32  ;;  %3170 = vmatprep.mubr.msk.bf16.mxu0 %vm922_vm2, %v3359_v33 }
  0x4d   : > { %3234 = vmatprep.mubr.msk.bf16.mxu1 %vm922_vm2, %v3360_v34 }
  0x53   : > { %3171 = vmatmul.mubr.msk.bf16.gmra.mrb[28].mxu0 %vm922_vm2, %v3361_v35 }
  0x54   : > { %3235 = vmatmul.mubr.msk.bf16.gmra.mrb[28].mxu1 %vm922_vm2, %v3362_v36  ;;  %3174 = vmatprep.mubr.msk.bf16.mxu0 %vm922_vm2, %v3363_v37 }
  0x55   : > { %3238 = vmatprep.mubr.msk.bf16.mxu1 %vm922_vm2, %v3364_v38 }
  0x5b   : > { %3175 = vmatmul.mubr.msk.bf16.gmra.mrb[32].mxu0 %vm922_vm2, %v3365_v39 }
  0x5c   : > { %3239 = vmatmul.mubr.msk.bf16.gmra.mrb[32].mxu1 %vm922_vm2, %v3366_v40  ;;  %3178 = vmatprep.mubr.msk.bf16.mxu0 %vm922_vm2, %v3367_v41 }
  0x5d   : > { %3242 = vmatprep.mubr.msk.bf16.mxu1 %vm922_vm2, %v3368_v42 }
  0x63   : > { %3179 = vmatmul.mubr.msk.bf16.gmra.mrb[36].mxu0 %vm922_vm2, %v3369_v43 }
  0x64   : > { %3243 = vmatmul.mubr.msk.bf16.gmra.mrb[36].mxu1 %vm922_vm2, %v3370_v44  ;;  %3182 = vmatprep.mubr.msk.bf16.mxu0 %vm922_vm2, %v3371_v45 }
  0x65   : > { %3246 = vmatprep.mubr.msk.bf16.mxu1 %vm922_vm2, %v3372_v46 }
  0x6b   : > { %3183 = vmatmul.mubr.msk.bf16.gmra.mrb[40].mxu0 %vm922_vm2, %v3373_v47 }
  0x6c   : > { %3247 = vmatmul.mubr.msk.bf16.gmra.mrb[40].mxu1 %vm922_vm2, %v3374_v48  ;;  %3186 = vmatprep.mubr.msk.bf16.mxu0 %vm922_vm2, %v3375_v49 }
  0x6d   : > { %3250 = vmatprep.mubr.msk.bf16.mxu1 %vm922_vm2, %v3376_v50 }
  0x73   : > { %3187 = vmatmul.mubr.msk.bf16.gmra.mrb[44].mxu0 %vm922_vm2, %v3377_v51 }
  0x74   : > { %3251 = vmatmul.mubr.msk.bf16.gmra.mrb[44].mxu1 %vm922_vm2, %v3378_v52  ;;  %3190 = vmatprep.mubr.msk.bf16.mxu0 %vm922_vm2, %v3379_v53 }
  0x75   : > { %3254 = vmatprep.mubr.msk.bf16.mxu1 %vm922_vm2, %v3380_v54 }
  0x7b   : > { %3191 = vmatmul.mubr.msk.bf16.gmra.mrb[48].mxu0 %vm922_vm2, %v3381_v55 }
  0x7c   : > { %3255 = vmatmul.mubr.msk.bf16.gmra.mrb[48].mxu1 %vm922_vm2, %v3382_v56  ;;  %3194 = vmatprep.mubr.msk.bf16.mxu0 %vm922_vm2, %v3383_v57 }
  0x7d   : > { %3258 = vmatprep.mubr.msk.bf16.mxu1 %vm922_vm2, %v3384_v58 }
  0x83   : > { %3195 = vmatmul.mubr.msk.bf16.gmra.mrb[52].mxu0 %vm922_vm2, %v3385_v59 }
  0x84   : > { %3259 = vmatmul.mubr.msk.bf16.gmra.mrb[52].mxu1 %vm922_vm2, %v3386_v60  ;;  %3198 = vmatprep.mubr.msk.bf16.mxu0 %vm922_vm2, %v3387_v61 }
  0x85   : > { %3262 = vmatprep.mubr.msk.bf16.mxu1 %vm922_vm2, %v3388_v62 }
  0x8b   : > { %3199 = vmatmul.mubr.msk.bf16.gmra.mrb[56].mxu0 %vm922_vm2, %v3389_v63 }
  0x8c   : > { %3263 = vmatmul.mubr.msk.bf16.gmra.mrb[56].mxu1 %vm922_vm2, %v3390_v0  ;;  %3202 = vmatprep.mubr.msk.bf16.mxu0 %vm922_vm2, %v3391_v1 }
  0x8d   : > { %3266 = vmatprep.mubr.msk.bf16.mxu1 %vm922_vm2, %v3392_v2 }
  0x93   : > { %3203 = vmatmul.mubr.msk.bf16.gmra.mrb[60].mxu0 %vm922_vm2, %v3393_v3 }
  0x94   : > { %3267 = vmatmul.mubr.msk.bf16.gmra.mrb[60].mxu1 %vm922_vm2, %v3394_v4 }
  0xee   : > { %v3144_v5 = vpop.f32.mrb[0].mxu0 }
  0xef   : > { %v3208_v7 = vpop.f32.mrb[0].mxu1  ;;  %v1156_v8 = vpop.f32.mrb[1].mxu0  ;;  %v2063_v11 = vadd.f32 %v3144_v5, %v3695_v6 }
  0xf0   : > { %v1412_v9 = vpop.f32.mrb[1].mxu1  ;;  %v3145_v10 = vpop.f32.mrb[2].mxu0  ;;  %v2127_v14 = vadd.f32 %v3208_v7, %v3695_v6  ;;  %v2061_v15 = vadd.f32 %v3695_v6, %v1156_v8 }
  0xf1   : > { %v3209_v12 = vpop.f32.mrb[2].mxu1  ;;  %v1159_v13 = vpop.f32.mrb[3].mxu0  ;;  %vm2191_vm3 = vcmp.ge.f32.partialorder %v2063_v11, 0.0  ;;  %v2319_v17 = vmul.f32 0.2, %v2063_v11  ;;  %v2125_v18 = vadd.f32 %v3695_v6, %v1412_v9  ;;  %v2064_v19 = vadd.f32 %v3145_v10, %v3695_v6 }
  0xf2   : > { %v1415_v16 = vpop.f32.mrb[3].mxu1  ;;  %vm2255_vm4 = vcmp.ge.f32.partialorder %v2127_v14, 0.0  ;;  %v2383_v20 = vmul.f32 0.2, %v2127_v14  ;;  %vm2189_vm5 = vcmp.ge.f32.partialorder %v2061_v15, 0.0  ;;  %v2128_v32 = vadd.f32 %v3209_v12, %v3695_v6 }
  0xf3   : > { %v2317_v21 = vmul.f32 0.2, %v2061_v15  ;;  %v2447_v22 = vsel %vm2191_vm3, %v2063_v11, %v2319_v17  ;;  %vm2253_vm6 = vcmp.ge.f32.partialorder %v2125_v18, 0.0  ;;  %v2381_v23 = vmul.f32 0.2, %v2125_v18 }
  0xf4   : > { %vm2192_vm7 = vcmp.ge.f32.partialorder %v2064_v19, 0.0  ;;  %v2575_v24 = vmul.f32 1.4142135, %v2447_v22  ;;  %v2511_v25 = vsel %vm2255_vm4, %v2127_v14, %v2383_v20  ;;  %v2320_v27 = vmul.f32 0.2, %v2064_v19 }
  0xf5   : > { %v2445_v26 = vsel %vm2189_vm5, %v2061_v15, %v2317_v21  ;;  %v2639_v29 = vmul.f32 1.4142135, %v2511_v25  ;;  %v2509_v31 = vsel %vm2253_vm6, %v2125_v18, %v2381_v23  ;;  %v2062_v37 = vadd.f32 %v3695_v6, %v1159_v13 }
  0xf6   : > { %v3148_v28 = vpop.f32.mrb[4].mxu0  ;;  %v2573_v30 = vmul.f32 1.4142135, %v2445_v26  ;;  %2703 = vst [vmem:[%s3706_s10 + $0x10] sm:$0xff] %v2575_v24  ;;  %v2637_v35 = vmul.f32 1.4142135, %v2509_v31  ;;  %v2448_v36 = vsel %vm2192_vm7, %v2064_v19, %v2320_v27  ;;  %v2126_v44 = vadd.f32 %v3695_v6, %v1415_v16 }
  0xf7   : > { %v3212_v33 = vpop.f32.mrb[4].mxu1  ;;  %v1172_v34 = vpop.f32.mrb[5].mxu0  ;;  %2767 = vst [vmem:[%s3706_s10 + $0x210] sm:$0xff] %v2639_v29  ;;  %v2576_v40 = vmul.f32 1.4142135, %v2448_v36  ;;  %vm2256_vm8 = vcmp.ge.f32.partialorder %v2128_v32, 0.0  ;;  %v2067_v48 = vadd.f32 %v3148_v28, %v3695_v6 }
  0xf8   : > { %v1428_v38 = vpop.f32.mrb[5].mxu1  ;;  %v3149_v39 = vpop.f32.mrb[6].mxu0  ;;  %2701 = vst [vmem:[%s3706_s10] sm:$0xff] %v2573_v30  ;;  %v2384_v41 = vmul.f32 0.2, %v2128_v32  ;;  %2765 = vst [vmem:[%s3706_s10 + $0x200] sm:$0xff] %v2637_v35  ;;  %vm2190_vm9 = vcmp.ge.f32.partialorder %v2062_v37, 0.0  ;;  %v2131_v54 = vadd.f32 %v3212_v33, %v3695_v6  ;;  %v2065_v56 = vadd.f32 %v3695_v6, %v1172_v34 }
  0xf9   : > { %v3213_v42 = vpop.f32.mrb[6].mxu1  ;;  %v2318_v43 = vmul.f32 0.2, %v2062_v37  ;;  %v1175_v45 = vpop.f32.mrb[7].mxu0  ;;  %2704 = vst [vmem:[%s3706_s10 + $0x18] sm:$0xff] %v2576_v40  ;;  %vm2254_vm10 = vcmp.ge.f32.partialorder %v2126_v44, 0.0  ;;  %v2129_v57 = vadd.f32 %v3695_v6, %v1428_v38  ;;  %v2068_v3 = vadd.f32 %v3149_v39, %v3695_v6 }
  0xfa   : > { %v1431_v46 = vpop.f32.mrb[7].mxu1  ;;  %v2512_v47 = vsel %vm2256_vm8, %v2128_v32, %v2384_v41  ;;  %v2382_v51 = vmul.f32 0.2, %v2126_v44  ;;  %vm2195_vm11 = vcmp.ge.f32.partialorder %v2067_v48, 0.0  ;;  %v2323_v53 = vmul.f32 0.2, %v2067_v48 }
  0xfb   : > { %v2640_v49 = vmul.f32 1.4142135, %v2512_v47  ;;  %v2446_v50 = vsel %vm2190_vm9, %v2062_v37, %v2318_v43  ;;  %vm2259_vm12 = vcmp.ge.f32.partialorder %v2131_v54, 0.0  ;;  %v2387_v61 = vmul.f32 0.2, %v2131_v54 }
  0xfc   : > { %v2574_v52 = vmul.f32 1.4142135, %v2446_v50  ;;  %v2510_v55 = vsel %vm2254_vm10, %v2126_v44, %v2382_v51  ;;  %v2451_v60 = vsel %vm2195_vm11, %v2067_v48, %v2323_v53  ;;  %vm2193_vm13 = vcmp.ge.f32.partialorder %v2065_v56, 0.0 }
  0xfd   : > { %2768 = vst [vmem:[%s3706_s10 + $0x218] sm:$0xff] %v2640_v49  ;;  %v2638_v59 = vmul.f32 1.4142135, %v2510_v55  ;;  %v2579_v63 = vmul.f32 1.4142135, %v2451_v60  ;;  %vm2257_vm14 = vcmp.ge.f32.partialorder %v2129_v57, 0.0  ;;  %v2515_v1 = vsel %vm2259_vm12, %v2131_v54, %v2387_v61 }
  0xfe   : > { %v3152_v58 = vpop.f32.mrb[8].mxu0  ;;  %2702 = vst [vmem:[%s3706_s10 + $0x8] sm:$0xff] %v2574_v52  ;;  %v2321_v0 = vmul.f32 0.2, %v2065_v56  ;;  %v2385_v2 = vmul.f32 0.2, %v2129_v57  ;;  %v2132_v16 = vadd.f32 %v3213_v42, %v3695_v6  ;;  %v2066_v17 = vadd.f32 %v3695_v6, %v1175_v45 }
  0xff   : > { %v3216_v62 = vpop.f32.mrb[8].mxu1  ;;  %2766 = vst [vmem:[%s3706_s10 + $0x208] sm:$0xff] %v2638_v59  ;;  %v1188_v4 = vpop.f32.mrb[9].mxu0  ;;  %2707 = vst [vmem:[%s3706_s10 + $0x30] sm:$0xff] %v2579_v63  ;;  %v2643_v7 = vmul.f32 1.4142135, %v2515_v1  ;;  %v2130_v18 = vadd.f32 %v3695_v6, %v1431_v46  ;;  %v2071_v25 = vadd.f32 %v3152_v58, %v3695_v6 }
 0x100   : > { %v1444_v5 = vpop.f32.mrb[9].mxu1  ;;  %v2449_v8 = vsel %vm2193_vm13, %v2065_v56, %v2321_v0  ;;  %v3153_v9 = vpop.f32.mrb[10].mxu0  ;;  %v2513_v12 = vsel %vm2257_vm14, %v2129_v57, %v2385_v2  ;;  %vm2196_vm15 = vcmp.ge.f32.partialorder %v2068_v3, 0.0  ;;  %v2324_v13 = vmul.f32 0.2, %v2068_v3 }
 0x101   : > { %v3724_v10 = vpop.f32.mrb[10].mxu1  ;;  %v2577_v11 = vmul.f32 1.4142135, %v2449_v8  ;;  %v3726_v14 = vpop.f32.mrb[11].mxu0  ;;  %2771 = vst [vmem:[%s3706_s10 + $0x230] sm:$0xff] %v2643_v7  ;;  %vm2260_vm0 = vcmp.ge.f32.partialorder %v2132_v16, 0.0  ;;  %v2135_v28 = vadd.f32 %v3216_v62, %v3695_v6  ;;  %v2069_v29 = vadd.f32 %v3695_v6, %v1188_v4 }
 0x102   : > { %v2641_v15 = vmul.f32 1.4142135, %v2513_v12  ;;  %v3732_v19 = vpop.f32.mrb[11].mxu1  ;;  %v2452_v20 = vsel %vm2196_vm15, %v2068_v3, %v2324_v13  ;;  %v2388_v22 = vmul.f32 0.2, %v2132_v16  ;;  %vm2194_vm1 = vcmp.ge.f32.partialorder %v2066_v17, 0.0 }
 0x103   : > { %2705 = vst [vmem:[%s3706_s10 + $0x20] sm:$0xff] %v2577_v11  ;;  %v2580_v21 = vmul.f32 1.4142135, %v2452_v20  ;;  %v2322_v23 = vmul.f32 0.2, %v2066_v17  ;;  %vm2258_vm2 = vcmp.ge.f32.partialorder %v2130_v18, 0.0  ;;  %v2133_v40 = vadd.f32 %v3695_v6, %v1444_v5 }
 0x104   : > { %2769 = vst [vmem:[%s3706_s10 + $0x220] sm:$0xff] %v2641_v15  ;;  %v2386_v24 = vmul.f32 0.2, %v2130_v18  ;;  %v2516_v27 = vsel %vm2260_vm0, %v2132_v16, %v2388_v22  ;;  %vm2199_vm3 = vcmp.ge.f32.partialorder %v2071_v25, 0.0  ;;  %v2327_v39 = vmul.f32 0.2, %v2071_v25 }
 0x105   : > { %2708 = vst [vmem:[%s3706_s10 + $0x38] sm:$0xff] %v2580_v21  ;;  %v2644_v32 = vmul.f32 1.4142135, %v2516_v27  ;;  %v2450_v33 = vsel %vm2194_vm1, %v2066_v17, %v2322_v23  ;;  %vm2263_vm4 = vcmp.ge.f32.partialorder %v2135_v28, 0.0  ;;  %v2391_v41 = vmul.f32 0.2, %v2135_v28 }
 0x106   : > { %v3156_v26 = vpop.f32.mrb[12].mxu0  ;;  %v2514_v34 = vsel %vm2258_vm2, %v2130_v18, %v2386_v24  ;;  %v2578_v37 = vmul.f32 1.4142135, %v2450_v33  ;;  %vm2197_vm5 = vcmp.ge.f32.partialorder %v2069_v29, 0.0  ;;  %v2325_v42 = vmul.f32 0.2, %v2069_v29 }
 0x107   : > { %v3220_v30 = vpop.f32.mrb[12].mxu1  ;;  %v3740_v31 = vpop.f32.mrb[13].mxu0  ;;  %v2642_v38 = vmul.f32 1.4142135, %v2514_v34  ;;  %2772 = vst [vmem:[%s3706_s10 + $0x238] sm:$0xff] %v2644_v32  ;;  %v2455_v43 = vsel %vm2199_vm3, %v2071_v25, %v2327_v39  ;;  %vm2261_vm6 = vcmp.ge.f32.partialorder %v2133_v40, 0.0  ;;  %v2519_v48 = vsel %vm2263_vm4, %v2135_v28, %v2391_v41 }
 0x108   : > { %v3742_v35 = vpop.f32.mrb[13].mxu1  ;;  %v3744_v36 = vpop.f32.mrb[14].mxu0  ;;  %2706 = vst [vmem:[%s3706_s10 + $0x28] sm:$0xff] %v2578_v37  ;;  %v2389_v44 = vmul.f32 0.2, %v2133_v40  ;;  %v2453_v49 = vsel %vm2197_vm5, %v2069_v29, %v2325_v42  ;;  %v2072_v54 = vadd.f32 %v3153_v9, %v3695_v6  ;;  %v2136_v57 = vadd.f32 %v3724_v10, %v3695_v6 }
 0x109   : > { %2770 = vst [vmem:[%s3706_s10 + $0x228] sm:$0xff] %v2642_v38  ;;  %v3750_v45 = vpop.f32.mrb[14].mxu1  ;;  %v3752_v46 = vpop.f32.mrb[15].mxu0  ;;  %v2583_v47 = vmul.f32 1.4142135, %v2455_v43  ;;  %v2070_v0 = vadd.f32 %v3695_v6, %v3726_v14  ;;  %v2134_v1 = vadd.f32 %v3695_v6, %v3732_v19  ;;  %v2075_v5 = vadd.f32 %v3156_v26, %v3695_v6 }
 0x10a   : > { %v3754_v50 = vpop.f32.mrb[15].mxu1  ;;  %v2647_v51 = vmul.f32 1.4142135, %v2519_v48  ;;  %v2581_v52 = vmul.f32 1.4142135, %v2453_v49  ;;  %v2517_v53 = vsel %vm2261_vm6, %v2133_v40, %v2389_v44  ;;  %vm2200_vm7 = vcmp.ge.f32.partialorder %v2072_v54, 0.0 }
 0x10b   : > { %2711 = vst [vmem:[%s3706_s10 + $0x50] sm:$0xff] %v2583_v47  ;;  %v2645_v56 = vmul.f32 1.4142135, %v2517_v53  ;;  %v2328_v60 = vmul.f32 0.2, %v2072_v54  ;;  %vm2264_vm8 = vcmp.ge.f32.partialorder %v2136_v57, 0.0  ;;  %v2139_v7 = vadd.f32 %v3220_v30, %v3695_v6 }
 0x10c   : > { %2775 = vst [vmem:[%s3706_s10 + $0x250] sm:$0xff] %v2647_v51  ;;  %2709 = vst [vmem:[%s3706_s10 + $0x40] sm:$0xff] %v2581_v52  ;;  %v2392_v63 = vmul.f32 0.2, %v2136_v57  ;;  %vm2198_vm9 = vcmp.ge.f32.partialorder %v2070_v0, 0.0  ;;  %vm2262_vm10 = vcmp.ge.f32.partialorder %v2134_v1, 0.0  ;;  %v2073_v19 = vadd.f32 %v3695_v6, %v3740_v31 }
 0x10d   : > { %2773 = vst [vmem:[%s3706_s10 + $0x240] sm:$0xff] %v2645_v56  ;;  %v2456_v4 = vsel %vm2200_vm7, %v2072_v54, %v2328_v60  ;;  %v2326_v11 = vmul.f32 0.2, %v2070_v0  ;;  %v2390_v13 = vmul.f32 0.2, %v2134_v1  ;;  %vm2203_vm11 = vcmp.ge.f32.partialorder %v2075_v5, 0.0 }
 0x10e   : > { %v3757_v55 = vpop.f32.mrb[16].mxu0  ;;  %v2584_v9 = vmul.f32 1.4142135, %v2456_v4  ;;  %v2520_v10 = vsel %vm2264_vm8, %v2136_v57, %v2392_v63  ;;  %v2331_v15 = vmul.f32 0.2, %v2075_v5  ;;  %vm2267_vm12 = vcmp.ge.f32.partialorder %v2139_v7, 0.0 }
 0x10f   : > { %v3762_v58 = vpop.f32.mrb[16].mxu1  ;;  %v3764_v59 = vpop.f32.mrb[17].mxu0  ;;  %v2648_v12 = vmul.f32 1.4142135, %v2520_v10  ;;  %v2454_v14 = vsel %vm2198_vm9, %v2070_v0, %v2326_v11  ;;  %v2395_v16 = vmul.f32 0.2, %v2139_v7  ;;  %v2518_v18 = vsel %vm2262_vm10, %v2134_v1, %v2390_v13 }
 0x110   : > { %v3768_v61 = vpop.f32.mrb[17].mxu1  ;;  %v3770_v62 = vpop.f32.mrb[18].mxu0  ;;  %2712 = vst [vmem:[%s3706_s10 + $0x58] sm:$0xff] %v2584_v9  ;;  %v2582_v17 = vmul.f32 1.4142135, %v2454_v14  ;;  %v2459_v22 = vsel %vm2203_vm11, %v2075_v5, %v2331_v15  ;;  %vm2201_vm13 = vcmp.ge.f32.partialorder %v2073_v19, 0.0  ;;  %v2137_v28 = vadd.f32 %v3695_v6, %v3742_v35 }
 0x111   : > { %v3777_v2 = vpop.f32.mrb[18].mxu1  ;;  %v3779_v3 = vpop.f32.mrb[19].mxu0  ;;  %2776 = vst [vmem:[%s3706_s10 + $0x258] sm:$0xff] %v2648_v12  ;;  %v2646_v21 = vmul.f32 1.4142135, %v2518_v18  ;;  %v2523_v23 = vsel %vm2267_vm12, %v2139_v7, %v2395_v16  ;;  %v2076_v31 = vadd.f32 %v3744_v36, %v3695_v6  ;;  %v2140_v36 = vadd.f32 %v3750_v45, %v3695_v6 }
 0x112   : > { %v3783_v8 = vpop.f32.mrb[19].mxu1  ;;  %2710 = vst [vmem:[%s3706_s10 + $0x48] sm:$0xff] %v2582_v17  ;;  %v2587_v26 = vmul.f32 1.4142135, %v2459_v22  ;;  %v2651_v27 = vmul.f32 1.4142135, %v2523_v23  ;;  %v2074_v42 = vadd.f32 %v3695_v6, %v3752_v46  ;;  %v2138_v43 = vadd.f32 %v3695_v6, %v3754_v50 }
 0x113   : > { %2774 = vst [vmem:[%s3706_s10 + $0x248] sm:$0xff] %v2646_v21  ;;  %v2329_v30 = vmul.f32 0.2, %v2073_v19  ;;  %vm2265_vm14 = vcmp.ge.f32.partialorder %v2137_v28, 0.0  ;;  %v2393_v34 = vmul.f32 0.2, %v2137_v28  ;;  %v2079_v46 = vadd.f32 %v3757_v55, %v3695_v6 }
 0x114   : > { %2715 = vst [vmem:[%s3706_s10 + $0x70] sm:$0xff] %v2587_v26  ;;  %2779 = vst [vmem:[%s3706_s10 + $0x270] sm:$0xff] %v2651_v27  ;;  %vm2204_vm15 = vcmp.ge.f32.partialorder %v2076_v31, 0.0  ;;  %v2332_v39 = vmul.f32 0.2, %v2076_v31  ;;  %vm2268_vm0 = vcmp.ge.f32.partialorder %v2140_v36, 0.0  ;;  %v2143_v5 = vadd.f32 %v3762_v58, %v3695_v6 }
 0x115   : > { %v2457_v35 = vsel %vm2201_vm13, %v2073_v19, %v2329_v30  ;;  %v2521_v41 = vsel %vm2265_vm14, %v2137_v28, %v2393_v34  ;;  %v2396_v48 = vmul.f32 0.2, %v2140_v36  ;;  %vm2202_vm1 = vcmp.ge.f32.partialorder %v2074_v42, 0.0 }
 0x116   : > { %v3789_v20 = vpop.f32.mrb[20].mxu0  ;;  %v2585_v40 = vmul.f32 1.4142135, %v2457_v35  ;;  %v2649_v44 = vmul.f32 1.4142135, %v2521_v41  ;;  %v2460_v47 = vsel %vm2204_vm15, %v2076_v31, %v2332_v39  ;;  %vm2266_vm2 = vcmp.ge.f32.partialorder %v2138_v43, 0.0 }
 0x117   : > { %v3791_v24 = vpop.f32.mrb[20].mxu1  ;;  %v3793_v25 = vpop.f32.mrb[21].mxu0  ;;  %v2588_v49 = vmul.f32 1.4142135, %v2460_v47  ;;  %v2330_v51 = vmul.f32 0.2, %v2074_v42  ;;  %v2524_v45 = vsel %vm2268_vm0, %v2140_v36, %v2396_v48  ;;  %v2077_v7 = vadd.f32 %v3695_v6, %v3764_v59 }
 0x118   : > { %v3798_v29 = vpop.f32.mrb[21].mxu1  ;;  %v3803_v32 = vpop.f32.mrb[22].mxu0  ;;  %2713 = vst [vmem:[%s3706_s10 + $0x60] sm:$0xff] %v2585_v40  ;;  %2777 = vst [vmem:[%s3706_s10 + $0x260] sm:$0xff] %v2649_v44  ;;  %v2394_v52 = vmul.f32 0.2, %v2138_v43  ;;  %v2141_v9 = vadd.f32 %v3695_v6, %v3768_v61  ;;  %v2080_v16 = vadd.f32 %v3770_v62, %v3695_v6  ;;  %v2144_v17 = vadd.f32 %v3777_v2, %v3695_v6 }
 0x119   : > { %v3805_v33 = vpop.f32.mrb[22].mxu1  ;;  %v3809_v37 = vpop.f32.mrb[23].mxu0  ;;  %2716 = vst [vmem:[%s3706_s10 + $0x78] sm:$0xff] %v2588_v49  ;;  %v2652_v54 = vmul.f32 1.4142135, %v2524_v45  ;;  %v2458_v56 = vsel %vm2202_vm1, %v2074_v42, %v2330_v51  ;;  %vm2207_vm3 = vcmp.ge.f32.partialorder %v2079_v46, 0.0  ;;  %v2078_v18 = vadd.f32 %v3695_v6, %v3779_v3 }
 0x11a   : > { %v3811_v38 = vpop.f32.mrb[23].mxu1  ;;  %v2586_v63 = vmul.f32 1.4142135, %v2458_v56  ;;  %v2522_v0 = vsel %vm2266_vm2, %v2138_v43, %v2394_v52  ;;  %v2335_v1 = vmul.f32 0.2, %v2079_v46  ;;  %vm2271_vm4 = vcmp.ge.f32.partialorder %v2143_v5, 0.0 }
 0x11b   : > { %2780 = vst [vmem:[%s3706_s10 + $0x278] sm:$0xff] %v2652_v54  ;;  %v2650_v55 = vmul.f32 1.4142135, %v2522_v0  ;;  %v2399_v15 = vmul.f32 0.2, %v2143_v5  ;;  %vm2205_vm5 = vcmp.ge.f32.partialorder %v2077_v7, 0.0  ;;  %v2142_v2 = vadd.f32 %v3695_v6, %v3783_v8 }
 0x11c   : > { %2714 = vst [vmem:[%s3706_s10 + $0x68] sm:$0xff] %v2586_v63  ;;  %v2463_v12 = vsel %vm2207_vm3, %v2079_v46, %v2335_v1  ;;  %v2333_v58 = vmul.f32 0.2, %v2077_v7  ;;  %vm2269_vm6 = vcmp.ge.f32.partialorder %v2141_v9, 0.0  ;;  %v2397_v59 = vmul.f32 0.2, %v2141_v9 }
 0x11d   : > { %2778 = vst [vmem:[%s3706_s10 + $0x268] sm:$0xff] %v2650_v55  ;;  %v2591_v14 = vmul.f32 1.4142135, %v2463_v12  ;;  %v2527_v61 = vsel %vm2271_vm4, %v2143_v5, %v2399_v15  ;;  %vm2208_vm7 = vcmp.ge.f32.partialorder %v2080_v16, 0.0  ;;  %v2336_v30 = vmul.f32 0.2, %v2080_v16 }
 0x11e   : > { %v3823_v53 = vpop.f32.mrb[24].mxu0  ;;  %v2655_v21 = vmul.f32 1.4142135, %v2527_v61  ;;  %v2461_v22 = vsel %vm2205_vm5, %v2077_v7, %v2333_v58  ;;  %v2525_v23 = vsel %vm2269_vm6, %v2141_v9, %v2397_v59  ;;  %vm2272_vm8 = vcmp.ge.f32.partialorder %v2144_v17, 0.0 }
 0x11f   : > { %v3825_v50 = vpop.f32.mrb[24].mxu1  ;;  %v3828_v57 = vpop.f32.mrb[25].mxu0  ;;  %2719 = vst [vmem:[%s3706_s10 + $0x90] sm:$0xff] %v2591_v14  ;;  %v2589_v27 = vmul.f32 1.4142135, %v2461_v22  ;;  %vm2206_vm9 = vcmp.ge.f32.partialorder %v2078_v18, 0.0  ;;  %v2464_v34 = vsel %vm2208_vm7, %v2080_v16, %v2336_v30  ;;  %v2083_v49 = vadd.f32 %v3789_v20, %v3695_v6 }
 0x120   : > { %v3830_v60 = vpop.f32.mrb[25].mxu1  ;;  %v3832_v4 = vpop.f32.mrb[26].mxu0  ;;  %v2653_v28 = vmul.f32 1.4142135, %v2525_v23  ;;  %2783 = vst [vmem:[%s3706_s10 + $0x290] sm:$0xff] %v2655_v21  ;;  %vm2270_vm10 = vcmp.ge.f32.partialorder %v2142_v2, 0.0  ;;  %v2147_v52 = vadd.f32 %v3791_v24, %v3695_v6  ;;  %v2081_v63 = vadd.f32 %v3695_v6, %v3793_v25 }
 0x121   : > { %v3841_v10 = vpop.f32.mrb[26].mxu1  ;;  %v3843_v11 = vpop.f32.mrb[27].mxu0  ;;  %v2400_v3 = vmul.f32 0.2, %v2144_v17  ;;  %v2334_v31 = vmul.f32 0.2, %v2078_v18  ;;  %v2145_v20 = vadd.f32 %v3695_v6, %v3798_v29  ;;  %v2084_v55 = vadd.f32 %v3803_v32, %v3695_v6 }
 0x122   : > { %v3846_v13 = vpop.f32.mrb[27].mxu1  ;;  %2717 = vst [vmem:[%s3706_s10 + $0x80] sm:$0xff] %v2589_v27  ;;  %2781 = vst [vmem:[%s3706_s10 + $0x280] sm:$0xff] %v2653_v28  ;;  %v2398_v35 = vmul.f32 0.2, %v2142_v2  ;;  %vm2211_vm11 = vcmp.ge.f32.partialorder %v2083_v49, 0.0  ;;  %v2148_v5 = vadd.f32 %v3805_v33, %v3695_v6 }
 0x123   : > { %v2592_v40 = vmul.f32 1.4142135, %v2464_v34  ;;  %v2528_v41 = vsel %vm2272_vm8, %v2144_v17, %v2400_v3  ;;  %v2462_v8 = vsel %vm2206_vm9, %v2078_v18, %v2334_v31  ;;  %v2339_v46 = vmul.f32 0.2, %v2083_v49 }
 0x124   : > { %v2656_v44 = vmul.f32 1.4142135, %v2528_v41  ;;  %v2590_v47 = vmul.f32 1.4142135, %v2462_v8  ;;  %v2526_v48 = vsel %vm2270_vm10, %v2142_v2, %v2398_v35  ;;  %vm2275_vm12 = vcmp.ge.f32.partialorder %v2147_v52, 0.0 }
 0x125   : > { %2720 = vst [vmem:[%s3706_s10 + $0x98] sm:$0xff] %v2592_v40  ;;  %v2654_v45 = vmul.f32 1.4142135, %v2526_v48  ;;  %v2403_v56 = vmul.f32 0.2, %v2147_v52  ;;  %v2467_v24 = vsel %vm2211_vm11, %v2083_v49, %v2339_v46  ;;  %vm2209_vm13 = vcmp.ge.f32.partialorder %v2081_v63, 0.0 }
 0x126   : > { %v3856_v19 = vpop.f32.mrb[28].mxu0  ;;  %2784 = vst [vmem:[%s3706_s10 + $0x298] sm:$0xff] %v2656_v44  ;;  %2718 = vst [vmem:[%s3706_s10 + $0x88] sm:$0xff] %v2590_v47  ;;  %v2595_v25 = vmul.f32 1.4142135, %v2467_v24  ;;  %vm2273_vm14 = vcmp.ge.f32.partialorder %v2145_v20, 0.0  ;;  %v2082_v18 = vadd.f32 %v3695_v6, %v3809_v37  ;;  %v2146_v2 = vadd.f32 %v3695_v6, %v3811_v38 }
 0x127   : > { %v3858_v26 = vpop.f32.mrb[28].mxu1  ;;  %v3860_v62 = vpop.f32.mrb[29].mxu0  ;;  %2782 = vst [vmem:[%s3706_s10 + $0x288] sm:$0xff] %v2654_v45  ;;  %v2531_v12 = vsel %vm2275_vm12, %v2147_v52, %v2403_v56  ;;  %v2337_v29 = vmul.f32 0.2, %v2081_v63  ;;  %vm2212_vm15 = vcmp.ge.f32.partialorder %v2084_v55, 0.0  ;;  %v2087_v37 = vadd.f32 %v3823_v53, %v3695_v6 }
 0x128   : > { %v3867_v39 = vpop.f32.mrb[29].mxu1  ;;  %v3869_v36 = vpop.f32.mrb[30].mxu0  ;;  %v2659_v15 = vmul.f32 1.4142135, %v2531_v12  ;;  %v2401_v58 = vmul.f32 0.2, %v2145_v20  ;;  %v2151_v47 = vadd.f32 %v3825_v50, %v3695_v6  ;;  %v2085_v52 = vadd.f32 %v3695_v6, %v3828_v57 }
 0x129   : > { %v3871_v42 = vpop.f32.mrb[30].mxu1  ;;  %v3873_v43 = vpop.f32.mrb[31].mxu0  ;;  %2723 = vst [vmem:[%s3706_s10 + $0xb0] sm:$0xff] %v2595_v25  ;;  %v2465_v32 = vsel %vm2209_vm13, %v2081_v63, %v2337_v29  ;;  %v2340_v59 = vmul.f32 0.2, %v2084_v55  ;;  %vm2276_vm0 = vcmp.ge.f32.partialorder %v2148_v5, 0.0  ;;  %v2149_v46 = vadd.f32 %v3695_v6, %v3830_v60 }
 0x12a   : > { %v3877_v51 = vpop.f32.mrb[31].mxu1  ;;  %v2404_v33 = vmul.f32 0.2, %v2148_v5  ;;  %2787 = vst [vmem:[%s3706_s10 + $0x2b0] sm:$0xff] %v2659_v15  ;;  %v2593_v61 = vmul.f32 1.4142135, %v2465_v32  ;;  %v2529_v17 = vsel %vm2273_vm14, %v2145_v20, %v2401_v58  ;;  %v2088_v57 = vadd.f32 %v3832_v4, %v3695_v6 }
 0x12b   : > { %v2657_v22 = vmul.f32 1.4142135, %v2529_v17  ;;  %v2468_v23 = vsel %vm2212_vm15, %v2084_v55, %v2340_v59  ;;  %vm2210_vm1 = vcmp.ge.f32.partialorder %v2082_v18, 0.0  ;;  %v2338_v31 = vmul.f32 0.2, %v2082_v18 }
 0x12c   : > { %v2532_v27 = vsel %vm2276_vm0, %v2148_v5, %v2404_v33  ;;  %2721 = vst [vmem:[%s3706_s10 + $0xa0] sm:$0xff] %v2593_v61  ;;  %v2596_v28 = vmul.f32 1.4142135, %v2468_v23  ;;  %vm2274_vm2 = vcmp.ge.f32.partialorder %v2146_v2, 0.0  ;;  %v2402_v40 = vmul.f32 0.2, %v2146_v2 }
 0x12d   : > { %v2660_v30 = vmul.f32 1.4142135, %v2532_v27  ;;  %2785 = vst [vmem:[%s3706_s10 + $0x2a0] sm:$0xff] %v2657_v22  ;;  %v2466_v38 = vsel %vm2210_vm1, %v2082_v18, %v2338_v31  ;;  %vm2215_vm3 = vcmp.ge.f32.partialorder %v2087_v37, 0.0  ;;  %v2343_v44 = vmul.f32 0.2, %v2087_v37 }
 0x12e   : > { %v3884_v54 = vpop.f32.mrb[32].mxu0  ;;  %2724 = vst [vmem:[%s3706_s10 + $0xb8] sm:$0xff] %v2596_v28  ;;  %v2594_v49 = vmul.f32 1.4142135, %v2466_v38  ;;  %v2530_v45 = vsel %vm2274_vm2, %v2146_v2, %v2402_v40  ;;  %vm2279_vm4 = vcmp.ge.f32.partialorder %v2151_v47, 0.0  ;;  %vm2213_vm5 = vcmp.ge.f32.partialorder %v2085_v52, 0.0 }
 0x12f   : > { %v3891_v0 = vpop.f32.mrb[32].mxu1  ;;  %v3893_v1 = vpop.f32.mrb[33].mxu0  ;;  %2788 = vst [vmem:[%s3706_s10 + $0x2b8] sm:$0xff] %v2660_v30  ;;  %v2658_v63 = vmul.f32 1.4142135, %v2530_v45  ;;  %v2471_v20 = vsel %vm2215_vm3, %v2087_v37, %v2343_v44  ;;  %vm2277_vm6 = vcmp.ge.f32.partialorder %v2149_v46, 0.0  ;;  %v2152_v61 = vadd.f32 %v3841_v10, %v3695_v6 }
 0x130   : > { %v3899_v7 = vpop.f32.mrb[33].mxu1  ;;  %v3901_v9 = vpop.f32.mrb[34].mxu0  ;;  %v2407_v50 = vmul.f32 0.2, %v2151_v47  ;;  %2722 = vst [vmem:[%s3706_s10 + $0xa8] sm:$0xff] %v2594_v49  ;;  %vm2216_vm7 = vcmp.ge.f32.partialorder %v2088_v57, 0.0  ;;  %v2086_v4 = vadd.f32 %v3695_v6, %v3843_v11  ;;  %v2150_v17 = vadd.f32 %v3695_v6, %v3846_v13 }
 0x131   : > { %v3903_v14 = vpop.f32.mrb[34].mxu1  ;;  %v3906_v16 = vpop.f32.mrb[35].mxu0  ;;  %v2599_v24 = vmul.f32 1.4142135, %v2471_v20  ;;  %v2341_v55 = vmul.f32 0.2, %v2085_v52  ;;  %v2091_v13 = vadd.f32 %v3856_v19, %v3695_v6  ;;  %v2155_v40 = vadd.f32 %v3858_v26, %v3695_v6 }
 0x132   : > { %v3911_v21 = vpop.f32.mrb[35].mxu1  ;;  %2786 = vst [vmem:[%s3706_s10 + $0x2a8] sm:$0xff] %v2658_v63  ;;  %v2535_v5 = vsel %vm2279_vm4, %v2151_v47, %v2407_v50  ;;  %v2405_v25 = vmul.f32 0.2, %v2149_v46  ;;  %v2344_v32 = vmul.f32 0.2, %v2088_v57  ;;  %v2089_v38 = vadd.f32 %v3695_v6, %v3860_v62 }
 0x133   : > { %2727 = vst [vmem:[%s3706_s10 + $0xd0] sm:$0xff] %v2599_v24  ;;  %v2663_v60 = vmul.f32 1.4142135, %v2535_v5  ;;  %v2469_v12 = vsel %vm2213_vm5, %v2085_v52, %v2341_v55  ;;  %vm2280_vm8 = vcmp.ge.f32.partialorder %v2152_v61, 0.0  ;;  %v2408_v10 = vmul.f32 0.2, %v2152_v61 }
 0x134   : > { %v2597_v15 = vmul.f32 1.4142135, %v2469_v12  ;;  %v2533_v58 = vsel %vm2277_vm6, %v2149_v46, %v2405_v25  ;;  %v2472_v23 = vsel %vm2216_vm7, %v2088_v57, %v2344_v32  ;;  %vm2214_vm9 = vcmp.ge.f32.partialorder %v2086_v4, 0.0 }
 0x135   : > { %2791 = vst [vmem:[%s3706_s10 + $0x2d0] sm:$0xff] %v2663_v60  ;;  %v2661_v33 = vmul.f32 1.4142135, %v2533_v58  ;;  %v2600_v30 = vmul.f32 1.4142135, %v2472_v23  ;;  %vm2278_vm10 = vcmp.ge.f32.partialorder %v2150_v17, 0.0  ;;  %v2536_v37 = vsel %vm2280_vm8, %v2152_v61, %v2408_v10 }
 0x136   : > { %v3916_v3 = vpop.f32.mrb[36].mxu0  ;;  %2725 = vst [vmem:[%s3706_s10 + $0xc0] sm:$0xff] %v2597_v15  ;;  %v2342_v11 = vmul.f32 0.2, %v2086_v4  ;;  %v2406_v2 = vmul.f32 0.2, %v2150_v17  ;;  %v2153_v63 = vadd.f32 %v3695_v6, %v3867_v39 }
 0x137   : > { %v3921_v34 = vpop.f32.mrb[36].mxu1  ;;  %v3923_v35 = vpop.f32.mrb[37].mxu0  ;;  %2789 = vst [vmem:[%s3706_s10 + $0x2c0] sm:$0xff] %v2661_v33  ;;  %2728 = vst [vmem:[%s3706_s10 + $0xd8] sm:$0xff] %v2600_v30  ;;  %v2664_v47 = vmul.f32 1.4142135, %v2536_v37 }
 0x138   : > { %v3927_v41 = vpop.f32.mrb[37].mxu1  ;;  %v3929_v8 = vpop.f32.mrb[38].mxu0  ;;  %v2470_v49 = vsel %vm2214_vm9, %v2086_v4, %v2342_v11  ;;  %v2534_v45 = vsel %vm2278_vm10, %v2150_v17, %v2406_v2  ;;  %vm2219_vm11 = vcmp.ge.f32.partialorder %v2091_v13, 0.0  ;;  %v2347_v46 = vmul.f32 0.2, %v2091_v13 }
 0x139   : > { %v3933_v53 = vpop.f32.mrb[38].mxu1  ;;  %v3935_v48 = vpop.f32.mrb[39].mxu0  ;;  %v2598_v52 = vmul.f32 1.4142135, %v2470_v49  ;;  %v2662_v19 = vmul.f32 1.4142135, %v2534_v45 }
 0x13a   : > { %v3941_v56 = vpop.f32.mrb[39].mxu1  ;;  %2792 = vst [vmem:[%s3706_s10 + $0x2d8] sm:$0xff] %v2664_v47  ;;  %vm2283_vm12 = vcmp.ge.f32.partialorder %v2155_v40, 0.0  ;;  %v2411_v26 = vmul.f32 0.2, %v2155_v40  ;;  %vm2217_vm13 = vcmp.ge.f32.partialorder %v2089_v38, 0.0  ;;  %v2475_v62 = vsel %vm2219_vm11, %v2091_v13, %v2347_v46 }
 0x13b   : > { %v2345_v20 = vmul.f32 0.2, %v2089_v38  ;;  %2726 = vst [vmem:[%s3706_s10 + $0xc8] sm:$0xff] %v2598_v52  ;;  %2790 = vst [vmem:[%s3706_s10 + $0x2c8] sm:$0xff] %v2662_v19  ;;  %vm2281_vm14 = vcmp.ge.f32.partialorder %v2153_v63, 0.0 }
 0x13c   : > { %v2409_v50 = vmul.f32 0.2, %v2153_v63  ;;  %v2603_v5 = vmul.f32 1.4142135, %v2475_v62  ;;  %v2539_v25 = vsel %vm2283_vm12, %v2155_v40, %v2411_v26  ;;  %v3996_v58 = vld [vmem:[%s4337_s2] ss:$0 sm:$0xff] }
 0x13d   : > { %v2473_v57 = vsel %vm2217_vm13, %v2089_v38, %v2345_v20  ;;  %v2667_v60 = vmul.f32 1.4142135, %v2539_v25  ;;  %v2092_v32 = vadd.f32 %v3996_v58, %v3869_v36  ;;  %v2156_v17 = vadd.f32 %v3996_v58, %v3871_v42 }
 0x13e   : > { %v3948_v29 = vpop.f32.mrb[40].mxu0  ;;  %v2601_v12 = vmul.f32 1.4142135, %v2473_v57  ;;  %v2537_v15 = vsel %vm2281_vm14, %v2153_v63, %v2409_v50  ;;  %2731 = vst [vmem:[%s3706_s10 + $0xf0] sm:$0xff] %v2603_v5  ;;  %v2090_v11 = vadd.f32 %v3996_v58, %v3873_v43  ;;  %v2154_v2 = vadd.f32 %v3996_v58, %v3877_v51 }
 0x13f   : > { %v3950_v59 = vpop.f32.mrb[40].mxu1  ;;  %v3959_v18 = vpop.f32.mrb[41].mxu0  ;;  %v2665_v4 = vmul.f32 1.4142135, %v2537_v15  ;;  %2795 = vst [vmem:[%s3706_s10 + $0x2f0] sm:$0xff] %v2667_v60  ;;  %vm2220_vm15 = vcmp.ge.f32.partialorder %v2092_v32, 0.0  ;;  %v2095_v42 = vadd.f32 %v3996_v58, %v3884_v54  ;;  %v2159_v37 = vadd.f32 %v3996_v58, %v3891_v0 }
 0x140   : > { %v3961_v22 = vpop.f32.mrb[41].mxu1  ;;  %v3964_v27 = vpop.f32.mrb[42].mxu0  ;;  %2729 = vst [vmem:[%s3706_s10 + $0xe0] sm:$0xff] %v2601_v12  ;;  %v2348_v10 = vmul.f32 0.2, %v2092_v32  ;;  %vm2284_vm0 = vcmp.ge.f32.partialorder %v2156_v17, 0.0  ;;  %v2093_v26 = vadd.f32 %v3996_v58, %v3893_v1  ;;  %v2157_v1 = vadd.f32 %v3996_v58, %v3899_v7 }
 0x141   : > { %v3966_v28 = vpop.f32.mrb[42].mxu1  ;;  %v3971_v31 = vpop.f32.mrb[43].mxu0  ;;  %2793 = vst [vmem:[%s3706_s10 + $0x2e0] sm:$0xff] %v2665_v4  ;;  %v2412_v36 = vmul.f32 0.2, %v2156_v17  ;;  %vm2218_vm1 = vcmp.ge.f32.partialorder %v2090_v11, 0.0  ;;  %v2160_v7 = vadd.f32 %v3996_v58, %v3903_v14 }
 0x142   : > { %v3978_v44 = vpop.f32.mrb[43].mxu1  ;;  %v2476_v13 = vsel %vm2220_vm15, %v2092_v32, %v2348_v10  ;;  %v2346_v49 = vmul.f32 0.2, %v2090_v11  ;;  %vm2282_vm2 = vcmp.ge.f32.partialorder %v2154_v2, 0.0  ;;  %v2410_v52 = vmul.f32 0.2, %v2154_v2 }
 0x143   : > { %v2604_v38 = vmul.f32 1.4142135, %v2476_v13  ;;  %v2540_v47 = vsel %vm2284_vm0, %v2156_v17, %v2412_v36  ;;  %vm2223_vm3 = vcmp.ge.f32.partialorder %v2095_v42, 0.0  ;;  %v2351_v54 = vmul.f32 0.2, %v2095_v42 }
 0x144   : > { %v2668_v43 = vmul.f32 1.4142135, %v2540_v47  ;;  %v2474_v51 = vsel %vm2218_vm1, %v2090_v11, %v2346_v49  ;;  %vm2287_vm4 = vcmp.ge.f32.partialorder %v2159_v37, 0.0  ;;  %v2415_v19 = vmul.f32 0.2, %v2159_v37 }
 0x145   : > { %2732 = vst [vmem:[%s3706_s10 + $0xf8] sm:$0xff] %v2604_v38  ;;  %v2602_v46 = vmul.f32 1.4142135, %v2474_v51  ;;  %v2538_v63 = vsel %vm2282_vm2, %v2154_v2, %v2410_v52  ;;  %v2479_v5 = vsel %vm2223_vm3, %v2095_v42, %v2351_v54  ;;  %vm2221_vm5 = vcmp.ge.f32.partialorder %v2093_v26, 0.0 }
 0x146   : > { %v3985_v24 = vpop.f32.mrb[44].mxu0  ;;  %2796 = vst [vmem:[%s3706_s10 + $0x2f8] sm:$0xff] %v2668_v43  ;;  %v2666_v50 = vmul.f32 1.4142135, %v2538_v63  ;;  %v2543_v25 = vsel %vm2287_vm4, %v2159_v37, %v2415_v19  ;;  %v2607_v12 = vmul.f32 1.4142135, %v2479_v5  ;;  %v2096_v17 = vadd.f32 %v3996_v58, %v3901_v9 }
 0x147   : > { %v3987_v55 = vpop.f32.mrb[44].mxu1  ;;  %v3989_v6 = vpop.f32.mrb[45].mxu0  ;;  %2730 = vst [vmem:[%s3706_s10 + $0xe8] sm:$0xff] %v2602_v46  ;;  %v2671_v15 = vmul.f32 1.4142135, %v2543_v25  ;;  %vm2285_vm6 = vcmp.ge.f32.partialorder %v2157_v1, 0.0  ;;  %v2094_v38 = vadd.f32 %v3996_v58, %v3906_v16  ;;  %v2158_v47 = vadd.f32 %v3996_v58, %v3911_v21 }
 0x148   : > { %v3991_v39 = vpop.f32.mrb[45].mxu1  ;;  %v4000_v33 = vpop.f32.mrb[46].mxu0  ;;  %2794 = vst [vmem:[%s3706_s10 + $0x2e8] sm:$0xff] %v2666_v50  ;;  %v2349_v4 = vmul.f32 0.2, %v2093_v26  ;;  %2735 = vst [vmem:[%s3706_s10 + $0x110] sm:$0xff] %v2607_v12  ;;  %v2099_v63 = vadd.f32 %v3996_v58, %v3916_v3  ;;  %v2097_v3 = vadd.f32 %v3996_v58, %v3923_v35 }
 0x149   : > { %v4002_v61 = vpop.f32.mrb[46].mxu1  ;;  %v4007_v23 = vpop.f32.mrb[47].mxu0  ;;  %2799 = vst [vmem:[%s3706_s10 + $0x310] sm:$0xff] %v2671_v15  ;;  %v2413_v10 = vmul.f32 0.2, %v2157_v1  ;;  %vm2224_vm7 = vcmp.ge.f32.partialorder %v2096_v17, 0.0 }
 0x14a   : > { %v4009_v30 = vpop.f32.mrb[47].mxu1  ;;  %v2477_v11 = vsel %vm2221_vm5, %v2093_v26, %v2349_v4  ;;  %v2352_v2 = vmul.f32 0.2, %v2096_v17  ;;  %vm2288_vm8 = vcmp.ge.f32.partialorder %v2160_v7, 0.0  ;;  %v2416_v51 = vmul.f32 0.2, %v2160_v7 }
 0x14b   : > { %v2605_v37 = vmul.f32 1.4142135, %v2477_v11  ;;  %v2541_v9 = vsel %vm2285_vm6, %v2157_v1, %v2413_v10  ;;  %vm2222_vm9 = vcmp.ge.f32.partialorder %v2094_v38, 0.0  ;;  %v2350_v46 = vmul.f32 0.2, %v2094_v38 }
 0x14c   : > { %v2669_v52 = vmul.f32 1.4142135, %v2541_v9  ;;  %v2480_v14 = vsel %vm2224_vm7, %v2096_v17, %v2352_v2  ;;  %vm2286_vm10 = vcmp.ge.f32.partialorder %v2158_v47, 0.0  ;;  %v2544_v16 = vsel %vm2288_vm8, %v2160_v7, %v2416_v51 }
 0x14d   : > { %2733 = vst [vmem:[%s3706_s10 + $0x100] sm:$0xff] %v2605_v37  ;;  %v2608_v19 = vmul.f32 1.4142135, %v2480_v14  ;;  %v2414_v21 = vmul.f32 0.2, %v2158_v47  ;;  %v2478_v25 = vsel %vm2222_vm9, %v2094_v38, %v2350_v46  ;;  %vm2227_vm11 = vcmp.ge.f32.partialorder %v2099_v63, 0.0 }
 0x14e   : > { %v4022_v40 = vpop.f32.mrb[48].mxu0  ;;  %2797 = vst [vmem:[%s3706_s10 + $0x300] sm:$0xff] %v2669_v52  ;;  %v2672_v5 = vmul.f32 1.4142135, %v2544_v16  ;;  %v2606_v12 = vmul.f32 1.4142135, %v2478_v25  ;;  %v2163_v17 = vadd.f32 %v3996_v58, %v3921_v34  ;;  %v2161_v10 = vadd.f32 %v3996_v58, %v3927_v41 }
 0x14f   : > { %v4024_v45 = vpop.f32.mrb[48].mxu1  ;;  %v4027_v0 = vpop.f32.mrb[49].mxu0  ;;  %2736 = vst [vmem:[%s3706_s10 + $0x118] sm:$0xff] %v2608_v19  ;;  %v2542_v15 = vsel %vm2286_vm10, %v2158_v47, %v2414_v21  ;;  %v2355_v1 = vmul.f32 0.2, %v2099_v63  ;;  %vm2225_vm13 = vcmp.ge.f32.partialorder %v2097_v3, 0.0  ;;  %v2100_v41 = vadd.f32 %v3996_v58, %v3929_v8 }
 0x150   : > { %v4032_v20 = vpop.f32.mrb[49].mxu1  ;;  %v4034_v62 = vpop.f32.mrb[50].mxu0  ;;  %2800 = vst [vmem:[%s3706_s10 + $0x318] sm:$0xff] %v2672_v5  ;;  %v2670_v4 = vmul.f32 1.4142135, %v2542_v15  ;;  %2734 = vst [vmem:[%s3706_s10 + $0x108] sm:$0xff] %v2606_v12  ;;  %v2164_v14 = vadd.f32 %v3996_v58, %v3933_v53  ;;  %v2098_v51 = vadd.f32 %v3996_v58, %v3935_v48  ;;  %v2162_v48 = vadd.f32 %v3996_v58, %v3941_v56 }
 0x151   : > { %v4036_v57 = vpop.f32.mrb[50].mxu1  ;;  %v4038_v60 = vpop.f32.mrb[51].mxu0  ;;  %v2483_v2 = vsel %vm2227_vm11, %v2099_v63, %v2355_v1  ;;  %vm2291_vm12 = vcmp.ge.f32.partialorder %v2163_v17, 0.0  ;;  %v2419_v38 = vmul.f32 0.2, %v2163_v17  ;;  %vm2289_vm14 = vcmp.ge.f32.partialorder %v2161_v10, 0.0 }
 0x152   : > { %v4043_v32 = vpop.f32.mrb[51].mxu1  ;;  %2798 = vst [vmem:[%s3706_s10 + $0x308] sm:$0xff] %v2670_v4  ;;  %v2611_v9 = vmul.f32 1.4142135, %v2483_v2  ;;  %v2353_v34 = vmul.f32 0.2, %v2097_v3 }
 0x153   : > { %v2417_v35 = vmul.f32 0.2, %v2161_v10  ;;  %v2547_v52 = vsel %vm2291_vm12, %v2163_v17, %v2419_v38  ;;  %vm2228_vm15 = vcmp.ge.f32.partialorder %v2100_v41, 0.0  ;;  %v2356_v53 = vmul.f32 0.2, %v2100_v41 }
 0x154   : > { %2739 = vst [vmem:[%s3706_s10 + $0x130] sm:$0xff] %v2611_v9  ;;  %v2675_v16 = vmul.f32 1.4142135, %v2547_v52  ;;  %v2481_v21 = vsel %vm2225_vm13, %v2097_v3, %v2353_v34  ;;  %vm2292_vm0 = vcmp.ge.f32.partialorder %v2164_v14, 0.0  ;;  %v2420_v15 = vmul.f32 0.2, %v2164_v14 }
 0x155   : > { %v2545_v8 = vsel %vm2289_vm14, %v2161_v10, %v2417_v35  ;;  %v2609_v25 = vmul.f32 1.4142135, %v2481_v21  ;;  %vm2226_vm1 = vcmp.ge.f32.partialorder %v2098_v51, 0.0  ;;  %v2354_v1 = vmul.f32 0.2, %v2098_v51 }
 0x156   : > { %v4050_v36 = vpop.f32.mrb[52].mxu0  ;;  %v2673_v12 = vmul.f32 1.4142135, %v2545_v8  ;;  %2803 = vst [vmem:[%s3706_s10 + $0x330] sm:$0xff] %v2675_v16  ;;  %v2484_v4 = vsel %vm2228_vm15, %v2100_v41, %v2356_v53  ;;  %vm2290_vm2 = vcmp.ge.f32.partialorder %v2162_v48, 0.0  ;;  %v2548_v2 = vsel %vm2292_vm0, %v2164_v14, %v2420_v15 }
 0x157   : > { %v4054_v13 = vpop.f32.mrb[52].mxu1  ;;  %v4056_v42 = vpop.f32.mrb[53].mxu0  ;;  %2737 = vst [vmem:[%s3706_s10 + $0x120] sm:$0xff] %v2609_v25  ;;  %v2418_v17 = vmul.f32 0.2, %v2162_v48  ;;  %v2482_v9 = vsel %vm2226_vm1, %v2098_v51, %v2354_v1  ;;  %v2103_v41 = vadd.f32 %v3996_v58, %v3948_v29  ;;  %v2167_v14 = vadd.f32 %v3996_v58, %v3950_v59 }
 0x158   : > { %v4062_v49 = vpop.f32.mrb[53].mxu1  ;;  %v4064_v43 = vpop.f32.mrb[54].mxu0  ;;  %2801 = vst [vmem:[%s3706_s10 + $0x320] sm:$0xff] %v2673_v12  ;;  %v2612_v10 = vmul.f32 1.4142135, %v2484_v4  ;;  %v2165_v59 = vadd.f32 %v3996_v58, %v3961_v22  ;;  %v2104_v1 = vadd.f32 %v3996_v58, %v3964_v27  ;;  %v2168_v4 = vadd.f32 %v3996_v58, %v3966_v28 }
 0x159   : > { %v4066_v54 = vpop.f32.mrb[54].mxu1  ;;  %v4072_v26 = vpop.f32.mrb[55].mxu0  ;;  %v2676_v34 = vmul.f32 1.4142135, %v2548_v2  ;;  %v2610_v35 = vmul.f32 1.4142135, %v2482_v9  ;;  %v2546_v52 = vsel %vm2290_vm2, %v2162_v48, %v2418_v17  ;;  %v2101_v48 = vadd.f32 %v3996_v58, %v3959_v18 }
 0x15a   : > { %v4074_v50 = vpop.f32.mrb[55].mxu1  ;;  %2740 = vst [vmem:[%s3706_s10 + $0x138] sm:$0xff] %v2612_v10  ;;  %v2674_v8 = vmul.f32 1.4142135, %v2546_v52  ;;  %vm2231_vm3 = vcmp.ge.f32.partialorder %v2103_v41, 0.0  ;;  %vm2295_vm4 = vcmp.ge.f32.partialorder %v2167_v14, 0.0  ;;  %v2102_v52 = vadd.f32 %v3996_v58, %v3971_v31 }
 0x15b   : > { %2804 = vst [vmem:[%s3706_s10 + $0x338] sm:$0xff] %v2676_v34  ;;  %2738 = vst [vmem:[%s3706_s10 + $0x128] sm:$0xff] %v2610_v35  ;;  %v2359_v12 = vmul.f32 0.2, %v2103_v41  ;;  %v2423_v29 = vmul.f32 0.2, %v2167_v14 }
 0x15c   : > { %2802 = vst [vmem:[%s3706_s10 + $0x328] sm:$0xff] %v2674_v8  ;;  %vm2229_vm5 = vcmp.ge.f32.partialorder %v2101_v48, 0.0  ;;  %v2357_v2 = vmul.f32 0.2, %v2101_v48  ;;  %vm2293_vm6 = vcmp.ge.f32.partialorder %v2165_v59, 0.0  ;;  %vm2232_vm7 = vcmp.ge.f32.partialorder %v2104_v1, 0.0 }
 0x15d   : > { %v2487_v15 = vsel %vm2231_vm3, %v2103_v41, %v2359_v12  ;;  %v2551_v10 = vsel %vm2295_vm4, %v2167_v14, %v2423_v29  ;;  %v2421_v34 = vmul.f32 0.2, %v2165_v59  ;;  %v2360_v22 = vmul.f32 0.2, %v2104_v1 }
 0x15e   : > { %v4084_v11 = vpop.f32.mrb[56].mxu0  ;;  %v2615_v17 = vmul.f32 1.4142135, %v2487_v15  ;;  %v2679_v9 = vmul.f32 1.4142135, %v2551_v10  ;;  %v2485_v18 = vsel %vm2229_vm5, %v2101_v48, %v2357_v2  ;;  %vm2296_vm8 = vcmp.ge.f32.partialorder %v2168_v4, 0.0 }
 0x15f   : > { %v4087_v7 = vpop.f32.mrb[56].mxu1  ;;  %v4089_v37 = vpop.f32.mrb[57].mxu0  ;;  %v2424_v35 = vmul.f32 0.2, %v2168_v4  ;;  %v2613_v27 = vmul.f32 1.4142135, %v2485_v18  ;;  %v2549_v28 = vsel %vm2293_vm6, %v2165_v59, %v2421_v34  ;;  %v2488_v8 = vsel %vm2232_vm7, %v2104_v1, %v2360_v22 }
 0x160   : > { %v4094_v47 = vpop.f32.mrb[57].mxu1  ;;  %v4101_v19 = vpop.f32.mrb[58].mxu0  ;;  %2743 = vst [vmem:[%s3706_s10 + $0x150] sm:$0xff] %v2615_v17  ;;  %2807 = vst [vmem:[%s3706_s10 + $0x350] sm:$0xff] %v2679_v9  ;;  %v2677_v41 = vmul.f32 1.4142135, %v2549_v28  ;;  %v2166_v48 = vadd.f32 %v3996_v58, %v3978_v44  ;;  %v2107_v17 = vadd.f32 %v3996_v58, %v3985_v24  ;;  %v2105_v44 = vadd.f32 %v3996_v58, %v3989_v6 }
 0x161   : > { %v4103_v46 = vpop.f32.mrb[58].mxu1  ;;  %v4105_v63 = vpop.f32.mrb[59].mxu0  ;;  %v2552_v14 = vsel %vm2296_vm8, %v2168_v4, %v2424_v35  ;;  %2741 = vst [vmem:[%s3706_s10 + $0x140] sm:$0xff] %v2613_v27  ;;  %v2616_v12 = vmul.f32 1.4142135, %v2488_v8  ;;  %vm2230_vm9 = vcmp.ge.f32.partialorder %v2102_v52, 0.0  ;;  %v2171_v4 = vadd.f32 %v3996_v58, %v3987_v55 }
 0x162   : > { %v4107_v5 = vpop.f32.mrb[59].mxu1  ;;  %v2680_v29 = vmul.f32 1.4142135, %v2552_v14  ;;  %2805 = vst [vmem:[%s3706_s10 + $0x340] sm:$0xff] %v2677_v41  ;;  %v2358_v15 = vmul.f32 0.2, %v2102_v52  ;;  %v2169_v24 = vadd.f32 %v3996_v58, %v3991_v39  ;;  %v2108_v6 = vadd.f32 %v3996_v58, %v4000_v33 }
 0x163   : > { %2744 = vst [vmem:[%s3706_s10 + $0x158] sm:$0xff] %v2616_v12  ;;  %vm2294_vm10 = vcmp.ge.f32.partialorder %v2166_v48, 0.0  ;;  %v2422_v31 = vmul.f32 0.2, %v2166_v48  ;;  %vm2235_vm11 = vcmp.ge.f32.partialorder %v2107_v17, 0.0  ;;  %vm2299_vm12 = vcmp.ge.f32.partialorder %v2171_v4, 0.0 }
 0x164   : > { %2808 = vst [vmem:[%s3706_s10 + $0x358] sm:$0xff] %v2680_v29  ;;  %v2486_v59 = vsel %vm2230_vm9, %v2102_v52, %v2358_v15  ;;  %v2363_v1 = vmul.f32 0.2, %v2107_v17  ;;  %v2427_v18 = vmul.f32 0.2, %v2171_v4  ;;  %vm2233_vm13 = vcmp.ge.f32.partialorder %v2105_v44, 0.0 }
 0x165   : > { %v2614_v10 = vmul.f32 1.4142135, %v2486_v59  ;;  %v2550_v2 = vsel %vm2294_vm10, %v2166_v48, %v2422_v31  ;;  %v2361_v35 = vmul.f32 0.2, %v2105_v44  ;;  %vm2297_vm14 = vcmp.ge.f32.partialorder %v2169_v24, 0.0 }
 0x166   : > { %v4114_v3 = vpop.f32.mrb[60].mxu0  ;;  %v2678_v9 = vmul.f32 1.4142135, %v2550_v2  ;;  %v2491_v34 = vsel %vm2235_vm11, %v2107_v17, %v2363_v1  ;;  %v2555_v55 = vsel %vm2299_vm12, %v2171_v4, %v2427_v18  ;;  %v2425_v27 = vmul.f32 0.2, %v2169_v24 }
 0x167   : > { %v4116_v38 = vpop.f32.mrb[60].mxu1  ;;  %v4118_v56 = vpop.f32.mrb[61].mxu0  ;;  %2742 = vst [vmem:[%s3706_s10 + $0x148] sm:$0xff] %v2614_v10  ;;  %v2619_v22 = vmul.f32 1.4142135, %v2491_v34  ;;  %v2489_v28 = vsel %vm2233_vm13, %v2105_v44, %v2361_v35  ;;  %vm2236_vm15 = vcmp.ge.f32.partialorder %v2108_v6, 0.0  ;;  %v2172_v12 = vadd.f32 %v3996_v58, %v4002_v61 }
 0x168   : > { %v4122_v16 = vpop.f32.mrb[61].mxu1  ;;  %v4124_v21 = vpop.f32.mrb[62].mxu0  ;;  %2806 = vst [vmem:[%s3706_s10 + $0x348] sm:$0xff] %v2678_v9  ;;  %v2683_v39 = vmul.f32 1.4142135, %v2555_v55  ;;  %v2553_v41 = vsel %vm2297_vm14, %v2169_v24, %v2425_v27  ;;  %v2106_v29 = vadd.f32 %v3996_v58, %v4007_v23  ;;  %v2170_v48 = vadd.f32 %v3996_v58, %v4009_v30 }
 0x169   : > { %v4129_v51 = vpop.f32.mrb[62].mxu1  ;;  %v4131_v25 = vpop.f32.mrb[63].mxu0  ;;  %2747 = vst [vmem:[%s3706_s10 + $0x170] sm:$0xff] %v2619_v22  ;;  %v2617_v52 = vmul.f32 1.4142135, %v2489_v28  ;;  %vm2300_vm0 = vcmp.ge.f32.partialorder %v2172_v12, 0.0  ;;  %v2111_v61 = vadd.f32 %v3996_v58, %v4022_v40  ;;  %v2175_v23 = vadd.f32 %v3996_v58, %v4024_v45 }
 0x16a   : > { %v4135_v53 = vpop.f32.mrb[63].mxu1  ;;  %v2364_v8 = vmul.f32 0.2, %v2108_v6  ;;  %2811 = vst [vmem:[%s3706_s10 + $0x370] sm:$0xff] %v2683_v39  ;;  %v2681_v14 = vmul.f32 1.4142135, %v2553_v41  ;;  %v2109_v30 = vadd.f32 %v3996_v58, %v4027_v0  ;;  %v2173_v40 = vadd.f32 %v3996_v58, %v4032_v20 }
 0x16b   : > { %2745 = vst [vmem:[%s3706_s10 + $0x160] sm:$0xff] %v2617_v52  ;;  %v2428_v17 = vmul.f32 0.2, %v2172_v12  ;;  %vm2234_vm1 = vcmp.ge.f32.partialorder %v2106_v29, 0.0  ;;  %v2362_v31 = vmul.f32 0.2, %v2106_v29  ;;  %v2112_v39 = vadd.f32 %v3996_v58, %v4034_v62 }
 0x16c   : > { %v2492_v33 = vsel %vm2236_vm15, %v2108_v6, %v2364_v8  ;;  %2809 = vst [vmem:[%s3706_s10 + $0x360] sm:$0xff] %v2681_v14  ;;  %vm2298_vm2 = vcmp.ge.f32.partialorder %v2170_v48, 0.0  ;;  %v2426_v59 = vmul.f32 0.2, %v2170_v48  ;;  %vm2239_vm3 = vcmp.ge.f32.partialorder %v2111_v61, 0.0 }
 0x16d   : > { %v2620_v15 = vmul.f32 1.4142135, %v2492_v33  ;;  %v2556_v1 = vsel %vm2300_vm0, %v2172_v12, %v2428_v17  ;;  %v2490_v10 = vsel %vm2234_vm1, %v2106_v29, %v2362_v31  ;;  %v2367_v9 = vmul.f32 0.2, %v2111_v61 }
 0x16e   : > { %v2684_v4 = vmul.f32 1.4142135, %v2556_v1  ;;  %v2554_v2 = vsel %vm2298_vm2, %v2170_v48, %v2426_v59  ;;  %v2618_v44 = vmul.f32 1.4142135, %v2490_v10  ;;  %vm2303_vm4 = vcmp.ge.f32.partialorder %v2175_v23, 0.0 }
 0x16f   : > { %2748 = vst [vmem:[%s3706_s10 + $0x178] sm:$0xff] %v2620_v15  ;;  %v2682_v24 = vmul.f32 1.4142135, %v2554_v2  ;;  %v2431_v34 = vmul.f32 0.2, %v2175_v23  ;;  %vm2237_vm5 = vcmp.ge.f32.partialorder %v2109_v30, 0.0  ;;  %v2495_v0 = vsel %vm2239_vm3, %v2111_v61, %v2367_v9 }
 0x170   : > { %2812 = vst [vmem:[%s3706_s10 + $0x378] sm:$0xff] %v2684_v4  ;;  %v2365_v45 = vmul.f32 0.2, %v2109_v30  ;;  %2746 = vst [vmem:[%s3706_s10 + $0x168] sm:$0xff] %v2618_v44  ;;  %vm2301_vm6 = vcmp.ge.f32.partialorder %v2173_v40, 0.0  ;;  %v2176_v52 = vadd.f32 %v3996_v58, %v4036_v57  ;;  %vm2240_vm7 = vcmp.ge.f32.partialorder %v2112_v39, 0.0 }
 0x171   : > { %2810 = vst [vmem:[%s3706_s10 + $0x368] sm:$0xff] %v2682_v24  ;;  %v2429_v18 = vmul.f32 0.2, %v2173_v40  ;;  %v2623_v22 = vmul.f32 1.4142135, %v2495_v0  ;;  %v2559_v35 = vsel %vm2303_vm4, %v2175_v23, %v2431_v34  ;;  %v2110_v14 = vadd.f32 %v3996_v58, %v4038_v60 }
 0x172   : > { %v2493_v55 = vsel %vm2237_vm5, %v2109_v30, %v2365_v45  ;;  %v2687_v27 = vmul.f32 1.4142135, %v2559_v35  ;;  %v2368_v41 = vmul.f32 0.2, %v2112_v39  ;;  %vm2304_vm8 = vcmp.ge.f32.partialorder %v2176_v52, 0.0 }
 0x173   : > { %v2621_v6 = vmul.f32 1.4142135, %v2493_v55  ;;  %v2557_v20 = vsel %vm2301_vm6, %v2173_v40, %v2429_v18  ;;  %2751 = vst [vmem:[%s3706_s10 + $0x190] sm:$0xff] %v2623_v22  ;;  %v2432_v8 = vmul.f32 0.2, %v2176_v52  ;;  %v2174_v12 = vadd.f32 %v3996_v58, %v4043_v32 }
 0x174   : > { %v2685_v28 = vmul.f32 1.4142135, %v2557_v20  ;;  %2815 = vst [vmem:[%s3706_s10 + $0x390] sm:$0xff] %v2687_v27  ;;  %v2496_v62 = vsel %vm2240_vm7, %v2112_v39, %v2368_v41  ;;  %v2115_v29 = vadd.f32 %v3996_v58, %v4050_v36  ;;  %v2179_v57 = vadd.f32 %v3996_v58, %v4054_v13 }
 0x175   : > { %2749 = vst [vmem:[%s3706_s10 + $0x180] sm:$0xff] %v2621_v6  ;;  %v2624_v48 = vmul.f32 1.4142135, %v2496_v62  ;;  %v2560_v33 = vsel %vm2304_vm8, %v2176_v52, %v2432_v8  ;;  %vm2238_vm9 = vcmp.ge.f32.partialorder %v2110_v14, 0.0  ;;  %v2366_v15 = vmul.f32 0.2, %v2110_v14 }
 0x176   : > { %2813 = vst [vmem:[%s3706_s10 + $0x380] sm:$0xff] %v2685_v28  ;;  %v2688_v17 = vmul.f32 1.4142135, %v2560_v33  ;;  %vm2302_vm10 = vcmp.ge.f32.partialorder %v2174_v12, 0.0  ;;  %v2430_v31 = vmul.f32 0.2, %v2174_v12  ;;  %v2113_v61 = vadd.f32 %v3996_v58, %v4056_v42 }
 0x177   : > { %vm2243_vm11 = vcmp.ge.f32.partialorder %v2115_v29, 0.0  ;;  %2752 = vst [vmem:[%s3706_s10 + $0x198] sm:$0xff] %v2624_v48  ;;  %v2494_v60 = vsel %vm2238_vm9, %v2110_v14, %v2366_v15  ;;  %v2371_v32 = vmul.f32 0.2, %v2115_v29  ;;  %vm2307_vm12 = vcmp.ge.f32.partialorder %v2179_v57, 0.0 }
 0x178   : > { %v2435_v59 = vmul.f32 0.2, %v2179_v57  ;;  %2816 = vst [vmem:[%s3706_s10 + $0x398] sm:$0xff] %v2688_v17  ;;  %v2622_v36 = vmul.f32 1.4142135, %v2494_v60  ;;  %v2558_v13 = vsel %vm2302_vm10, %v2174_v12, %v2430_v31  ;;  %vm2241_vm13 = vcmp.ge.f32.partialorder %v2113_v61, 0.0 }
 0x179   : > { %v2686_v1 = vmul.f32 1.4142135, %v2558_v13  ;;  %v2499_v23 = vsel %vm2243_vm11, %v2115_v29, %v2371_v32  ;;  %v2177_v2 = vadd.f32 %v3996_v58, %v4062_v49  ;;  %v2369_v44 = vmul.f32 0.2, %v2113_v61 }
 0x17a   : > { %v2563_v30 = vsel %vm2307_vm12, %v2179_v57, %v2435_v59  ;;  %2750 = vst [vmem:[%s3706_s10 + $0x188] sm:$0xff] %v2622_v36  ;;  %v2627_v4 = vmul.f32 1.4142135, %v2499_v23  ;;  %v2116_v24 = vadd.f32 %v3996_v58, %v4064_v43  ;;  %v2180_v34 = vadd.f32 %v3996_v58, %v4066_v54 }
 0x17b   : > { %v2691_v10 = vmul.f32 1.4142135, %v2563_v30  ;;  %2814 = vst [vmem:[%s3706_s10 + $0x388] sm:$0xff] %v2686_v1  ;;  %vm2305_vm14 = vcmp.ge.f32.partialorder %v2177_v2, 0.0  ;;  %v2433_v42 = vmul.f32 0.2, %v2177_v2  ;;  %v2497_v9 = vsel %vm2241_vm13, %v2113_v61, %v2369_v44 }
 0x17c   : > { %2755 = vst [vmem:[%s3706_s10 + $0x1b0] sm:$0xff] %v2627_v4  ;;  %vm2244_vm15 = vcmp.ge.f32.partialorder %v2116_v24, 0.0  ;;  %v2372_v40 = vmul.f32 0.2, %v2116_v24  ;;  %v2625_v45 = vmul.f32 1.4142135, %v2497_v9  ;;  %v2114_v49 = vadd.f32 %v3996_v58, %v4072_v26 }
 0x17d   : > { %2819 = vst [vmem:[%s3706_s10 + $0x3b0] sm:$0xff] %v2691_v10  ;;  %v2561_v0 = vsel %vm2305_vm14, %v2177_v2, %v2433_v42  ;;  %v2178_v43 = vadd.f32 %v3996_v58, %v4074_v50  ;;  %vm2308_vm0 = vcmp.ge.f32.partialorder %v2180_v34, 0.0  ;;  %v2436_v35 = vmul.f32 0.2, %v2180_v34 }
 0x17e   : > { %v2689_v18 = vmul.f32 1.4142135, %v2561_v0  ;;  %v2500_v22 = vsel %vm2244_vm15, %v2116_v24, %v2372_v40  ;;  %2753 = vst [vmem:[%s3706_s10 + $0x1a0] sm:$0xff] %v2625_v45  ;;  %vm2242_vm1 = vcmp.ge.f32.partialorder %v2114_v49, 0.0  ;;  %v2370_v27 = vmul.f32 0.2, %v2114_v49 }
 0x17f   : > { %v2628_v55 = vmul.f32 1.4142135, %v2500_v22  ;;  %vm2306_vm2 = vcmp.ge.f32.partialorder %v2178_v43, 0.0  ;;  %v2564_v54 = vsel %vm2308_vm0, %v2180_v34, %v2436_v35  ;;  %v2434_v6 = vmul.f32 0.2, %v2178_v43 }
 0x180   : > { %2817 = vst [vmem:[%s3706_s10 + $0x3a0] sm:$0xff] %v2689_v18  ;;  %v2119_v26 = vadd.f32 %v3996_v58, %v4084_v11  ;;  %v2692_v50 = vmul.f32 1.4142135, %v2564_v54  ;;  %v2498_v20 = vsel %vm2242_vm1, %v2114_v49, %v2370_v27  ;;  %v2183_v8 = vadd.f32 %v3996_v58, %v4087_v7 }
 0x181   : > { %2756 = vst [vmem:[%s3706_s10 + $0x1b8] sm:$0xff] %v2628_v55  ;;  %v2626_v39 = vmul.f32 1.4142135, %v2498_v20  ;;  %v2562_v28 = vsel %vm2306_vm2, %v2178_v43, %v2434_v6  ;;  %v2117_v14 = vadd.f32 %v3996_v58, %v4089_v37  ;;  %v2181_v12 = vadd.f32 %v3996_v58, %v4094_v47 }
 0x182   : > { %vm2247_vm3 = vcmp.ge.f32.partialorder %v2119_v26, 0.0  ;;  %v2375_v52 = vmul.f32 0.2, %v2119_v26  ;;  %2820 = vst [vmem:[%s3706_s10 + $0x3b8] sm:$0xff] %v2692_v50  ;;  %v2690_v41 = vmul.f32 1.4142135, %v2562_v28  ;;  %v2120_v7 = vadd.f32 %v3996_v58, %v4101_v19 }
 0x183   : > { %2754 = vst [vmem:[%s3706_s10 + $0x1a8] sm:$0xff] %v2626_v39  ;;  %vm2311_vm4 = vcmp.ge.f32.partialorder %v2183_v8, 0.0  ;;  %v2439_v29 = vmul.f32 0.2, %v2183_v8  ;;  %vm2245_vm5 = vcmp.ge.f32.partialorder %v2117_v14, 0.0  ;;  %vm2309_vm6 = vcmp.ge.f32.partialorder %v2181_v12, 0.0 }
 0x184   : > { %v2503_v11 = vsel %vm2247_vm3, %v2119_v26, %v2375_v52  ;;  %2818 = vst [vmem:[%s3706_s10 + $0x3a8] sm:$0xff] %v2690_v41  ;;  %v2373_v57 = vmul.f32 0.2, %v2117_v14  ;;  %v2437_v48 = vmul.f32 0.2, %v2181_v12  ;;  %v2184_v37 = vadd.f32 %v3996_v58, %v4103_v46 }
 0x185   : > { %v2631_v62 = vmul.f32 1.4142135, %v2503_v11  ;;  %v2567_v33 = vsel %vm2311_vm4, %v2183_v8, %v2439_v29  ;;  %v2118_v47 = vadd.f32 %v3996_v58, %v4105_v63  ;;  %vm2248_vm7 = vcmp.ge.f32.partialorder %v2120_v7, 0.0 }
 0x186   : > { %v2695_v15 = vmul.f32 1.4142135, %v2567_v33  ;;  %v2501_v17 = vsel %vm2245_vm5, %v2117_v14, %v2373_v57  ;;  %v2565_v31 = vsel %vm2309_vm6, %v2181_v12, %v2437_v48  ;;  %v2376_v59 = vmul.f32 0.2, %v2120_v7 }
 0x187   : > { %2759 = vst [vmem:[%s3706_s10 + $0x1d0] sm:$0xff] %v2631_v62  ;;  %v2629_v60 = vmul.f32 1.4142135, %v2501_v17  ;;  %v2693_v32 = vmul.f32 1.4142135, %v2565_v31  ;;  %v2182_v19 = vadd.f32 %v3996_v58, %v4107_v5  ;;  %vm2312_vm8 = vcmp.ge.f32.partialorder %v2184_v37, 0.0 }
 0x188   : > { %2823 = vst [vmem:[%s3706_s10 + $0x3d0] sm:$0xff] %v2695_v15  ;;  %v2440_v36 = vmul.f32 0.2, %v2184_v37  ;;  %vm2246_vm9 = vcmp.ge.f32.partialorder %v2118_v47, 0.0  ;;  %v2374_v46 = vmul.f32 0.2, %v2118_v47  ;;  %v2504_v63 = vsel %vm2248_vm7, %v2120_v7, %v2376_v59 }
 0x189   : > { %2757 = vst [vmem:[%s3706_s10 + $0x1c0] sm:$0xff] %v2629_v60  ;;  %2821 = vst [vmem:[%s3706_s10 + $0x3c0] sm:$0xff] %v2693_v32  ;;  %vm2310_vm10 = vcmp.ge.f32.partialorder %v2182_v19, 0.0  ;;  %v2438_v13 = vmul.f32 0.2, %v2182_v19  ;;  %v2123_v10 = vadd.f32 %v3996_v58, %v4114_v3  ;;  %v2187_v44 = vadd.f32 %v3996_v58, %v4116_v38 }
 0x18a   : > { %v2632_v61 = vmul.f32 1.4142135, %v2504_v63  ;;  %v2568_v1 = vsel %vm2312_vm8, %v2184_v37, %v2440_v36  ;;  %v2502_v23 = vsel %vm2246_vm9, %v2118_v47, %v2374_v46  ;;  %v2121_v9 = vadd.f32 %v3996_v58, %v4118_v56 }
 0x18b   : > { %v2696_v30 = vmul.f32 1.4142135, %v2568_v1  ;;  %v2630_v4 = vmul.f32 1.4142135, %v2502_v23  ;;  %v2566_v5 = vsel %vm2310_vm10, %v2182_v19, %v2438_v13  ;;  %vm2251_vm11 = vcmp.ge.f32.partialorder %v2123_v10, 0.0 }
 0x18c   : > { %2760 = vst [vmem:[%s3706_s10 + $0x1d8] sm:$0xff] %v2632_v61  ;;  %v2694_v2 = vmul.f32 1.4142135, %v2566_v5  ;;  %v2379_v24 = vmul.f32 0.2, %v2123_v10  ;;  %vm2315_vm12 = vcmp.ge.f32.partialorder %v2187_v44, 0.0  ;;  %v2185_v40 = vadd.f32 %v3996_v58, %v4122_v16 }
 0x18d   : > { %2824 = vst [vmem:[%s3706_s10 + $0x3d8] sm:$0xff] %v2696_v30  ;;  %2758 = vst [vmem:[%s3706_s10 + $0x1c8] sm:$0xff] %v2630_v4  ;;  %v2443_v42 = vmul.f32 0.2, %v2187_v44  ;;  %v2124_v34 = vadd.f32 %v3996_v58, %v4124_v21  ;;  %v2188_v38 = vadd.f32 %v3996_v58, %v4129_v51  ;;  %vm2249_vm13 = vcmp.ge.f32.partialorder %v2121_v9, 0.0 }
 0x18e   : > { %2822 = vst [vmem:[%s3706_s10 + $0x3c8] sm:$0xff] %v2694_v2  ;;  %v2507_v3 = vsel %vm2251_vm11, %v2123_v10, %v2379_v24  ;;  %v2377_v49 = vmul.f32 0.2, %v2121_v9  ;;  %vm2313_vm14 = vcmp.ge.f32.partialorder %v2185_v40, 0.0  ;;  %v2441_v18 = vmul.f32 0.2, %v2185_v40 }
 0x18f   : > { %v2635_v45 = vmul.f32 1.4142135, %v2507_v3  ;;  %v2571_v0 = vsel %vm2315_vm12, %v2187_v44, %v2443_v42  ;;  %vm2252_vm15 = vcmp.ge.f32.partialorder %v2124_v34, 0.0  ;;  %v2380_v16 = vmul.f32 0.2, %v2124_v34 }
 0x190   : > { %v2699_v43 = vmul.f32 1.4142135, %v2571_v0  ;;  %v2505_v56 = vsel %vm2249_vm13, %v2121_v9, %v2377_v49  ;;  %vm2316_vm0 = vcmp.ge.f32.partialorder %v2188_v38, 0.0  ;;  %v2444_v22 = vmul.f32 0.2, %v2188_v38 }
 0x191   : > { %2763 = vst [vmem:[%s3706_s10 + $0x1f0] sm:$0xff] %v2635_v45  ;;  %v2633_v21 = vmul.f32 1.4142135, %v2505_v56  ;;  %v2569_v51 = vsel %vm2313_vm14, %v2185_v40, %v2441_v18  ;;  %v2122_v35 = vadd.f32 %v3996_v58, %v4131_v25  ;;  %v2508_v27 = vsel %vm2252_vm15, %v2124_v34, %v2380_v16 }
 0x192   : > { %2827 = vst [vmem:[%s3706_s10 + $0x3f0] sm:$0xff] %v2699_v43  ;;  %v2697_v55 = vmul.f32 1.4142135, %v2569_v51  ;;  %v2572_v54 = vsel %vm2316_vm0, %v2188_v38, %v2444_v22  ;;  %v2636_v6 = vmul.f32 1.4142135, %v2508_v27  ;;  %v2186_v50 = vadd.f32 %v3996_v58, %v4135_v53 }
 0x193   : > { %2761 = vst [vmem:[%s3706_s10 + $0x1e0] sm:$0xff] %v2633_v21  ;;  %v2700_v26 = vmul.f32 1.4142135, %v2572_v54  ;;  %vm2250_vm1 = vcmp.ge.f32.partialorder %v2122_v35, 0.0  ;;  %v2378_v20 = vmul.f32 0.2, %v2122_v35 }
 0x194   : > { %2825 = vst [vmem:[%s3706_s10 + $0x3e0] sm:$0xff] %v2697_v55  ;;  %2764 = vst [vmem:[%s3706_s10 + $0x1f8] sm:$0xff] %v2636_v6  ;;  %vm2314_vm2 = vcmp.ge.f32.partialorder %v2186_v50, 0.0  ;;  %v2442_v25 = vmul.f32 0.2, %v2186_v50 }
 0x195   : > { %2828 = vst [vmem:[%s3706_s10 + $0x3f8] sm:$0xff] %v2700_v26  ;;  %v2506_v39 = vsel %vm2250_vm1, %v2122_v35, %v2378_v20 }
 0x196   : > { %v2634_v28 = vmul.f32 1.4142135, %v2506_v39  ;;  %v2570_v52 = vsel %vm2314_vm2, %v2186_v50, %v2442_v25 }
 0x197   : > { %v2698_v58 = vmul.f32 1.4142135, %v2570_v52 }
 0x198   : > { %2762 = vst [vmem:[%s3706_s10 + $0x1e8] sm:$0xff] %v2634_v28 }
 0x199   : > { %2826 = vst [vmem:[%s3706_s10 + $0x3e8] sm:$0xff] %v2698_v58 }
 0x19a   : > { %3409 = shalt.err (!%p3406_p5)
}
 0x19b   : > { %s3410_s5 = scalar_lea.hbm %s4281_s27, 16384  ;;  %s3414_s8 = scalar_lea.hbm %s4338_s3, 32768 }
 0x19c   : > { %p3411_p6 = scmp.ne.s32.totalorder %s4281_s27, %s3410_s5  ;;  %p3415_p10 = scmp.lt.u32.totalorder %s4281_s27, %s4338_s3 }
 0x19d   : > { %p3416_p11 = scmp.lt.u32.totalorder %s3414_s8, %s3410_s5  ;;  %p3418_p13 = scmp.lt.u32.totalorder %s3410_s5, %s4281_s27 }
 0x19e   : > { %p3412_p7 = pnand %p3411_p6, %p3540_p4 }
 0x19f   : > { %p3417_p12 = por %p3416_p11, %p3415_p10 }
 0x1a0   : > { %p3413_p9 = pneg %p3412_p7 }
 0x1a1   : > { %p3419_p0 = por %p3418_p13, %p3417_p12 }
 0x1a3   : > { %p3420_p1 = pnand %p3419_p0, %p3413_p9 }
 0x1a5   : > { %3423 = shalt.err (!%p3420_p1)
}
 0x1a6   : > { %s3478_s11 = smov 128   ;;  %s3479_s18 = smov 8  }
 0x1a7   : > { %3272 = dma.vmem_to_hbm [thread:$0]  (%p3540_p4), %s4283_s21, 16384, %s4281_s27, %s4289_s15, %s3478_s11, %s3478_s11, %s3479_s18  }
 0x1a8 PF: > { %p3278_p2 = scmp.ge.s32.totalorder %s3474_s17, 2  ;;  %s2858_s19 = sand.u32 1, %s3454_s12  }
 0x1a9   : > { %s2859_s23 = scalar_lea.sflag [#allocation3], %s2858_s19 }
 0x1aa   : > { %p3275_p3 = pnand %p3278_p2, %p3547_p8 }
 0x1ac   : > { %3449 = dma.done.wait (!%p3275_p3), %s2859_s23, 16384  }
 0x1ad   : > { %3451 = vsyncadd (!%p3275_p3), %s2859_s23, 4294950912  ;;  %s16_s17 = sadd.s32 1, %s3474_s17   ;;  %s4341_s12 = smov %s3458_s13 }
 0x1ae   : > { %p13_p5 = scmp.ge.s32.totalorder %s16_s17, 4   ;;  %s4342_s13 = smov %s3462_s14 }
 0x1af   : > { %s4343_s14 = smov %s3553_s25  ;;  %s4344_s15 = smov %s3470_s16 }
 0x1b0   : > { %s4345_s16 = smov %s4347_s20  ;;  %15 = sbr.rel (!%p13_p5) target bundleno = 4 (0x4), region = 78 }
 0x1b7   :  { %2864 = vsyncpa [#allocation3], 1 }
 0x1b8   :  { %2866 = vsyncpa [#allocation3 + $0x1], 1 }

</bundles_post_ra>
